<compile_context>
chip_gen: v7x
topology: tpu7x:2x2x1
jax: 0.10.0
libtpu: 0.0.40
codegen_flags: <defaults>
</compile_context>

<pallas_src>
import functools

import numpy as np
import jax
import jax.numpy as jnp
from jax.experimental import pallas as pl
from jax.experimental.pallas import tpu as pltpu


def _parallel_mha_kernel(x_full_ref, x_bslice_ref, x_qslice_ref,
                         wi_ref, bi_ref, wo_ref, bo_ref,
                         out_ref, attw_ref, *, num_heads, blocks):
    """One expert per grid step.

    x_full_ref  : (B, L, E)        full input (resident across experts; the weights
                                   path needs keys for every batch element / position)
    x_bslice_ref: (blocks, L, E)   expert's batch slice (output path)
    x_qslice_ref: (B*blocks, E)    expert's query-position slice, all batch (weights path)
    wi_ref      : (E, 3E)          in_proj_weight.T, Q columns pre-scaled by 1/sqrt(hd)
    bi_ref      : (1, 3E)          in_proj_bias,     Q part pre-scaled by 1/sqrt(hd)
    wo_ref      : (E, E)           out_proj.weight.T
    bo_ref      : (1, E)           out_proj.bias
    out_ref     : (blocks, L, E)   attention output for the expert's batch slice
    attw_ref    : (B, blocks, L)   head-averaged weights for the expert's query rows
    """
    B, L, E = x_full_ref.shape
    H = num_heads
    hd = E // H

    wi = wi_ref[...]
    bi = bi_ref[...]
    wo = wo_ref[...]
    bo = bo_ref[...]
    wq, wk, wv = wi[:, 0:E], wi[:, E:2 * E], wi[:, 2 * E:3 * E]
    bq, bk, bv = bi[:, 0:E], bi[:, E:2 * E], bi[:, 2 * E:3 * E]

    def proj(x2d, w, b):
        # MXU matmul in the input dtype, f32 accumulation, f32 bias add.
        return jnp.dot(x2d, w, preferred_element_type=jnp.float32) + b.astype(jnp.float32)

    # ---------------- output path: expert's batch slice, all query rows ---------------
    xs2 = x_bslice_ref[...].reshape(blocks * L, E)            # sublane-aligned merge
    q = proj(xs2, wq, bq).reshape(blocks, L, E)
    k = proj(xs2, wk, bk).reshape(blocks, L, E)
    v = proj(xs2, wv, bv).reshape(blocks, L, E)

    out_acc = jnp.zeros((blocks * L, E), jnp.float32)
    for h in range(H):                      # static unroll; every matmul batched over `blocks`
        lo, hi = h * hd, (h + 1) * hd
        s = jnp.einsum('bqd,bkd->bqk', q[..., lo:hi], k[..., lo:hi],
                       preferred_element_type=jnp.float32)        # (blocks, L, L)
        s = s - jnp.max(s, axis=-1, keepdims=True)
        p = jnp.exp(s)
        p = p * pl.reciprocal(jnp.sum(p, axis=-1, keepdims=True))  # exact (keeps 1e-5 tol)
        o_h = jnp.einsum('bqk,bkd->bqd', p, v[..., lo:hi],
                         preferred_element_type=jnp.float32)       # (blocks, L, hd)
        # Fold head h straight into the out-projection: no head concatenate / scratch.
        out_acc = out_acc + jnp.dot(o_h.reshape(blocks * L, hd), wo[lo:hi, :],
                                    preferred_element_type=jnp.float32)
    out = out_acc + bo.astype(jnp.float32)
    out_ref[...] = out.reshape(blocks, L, E).astype(out_ref.dtype)

    # --------- weights path: all batch elements, the expert's query-row slice ---------
    qw2 = proj(x_qslice_ref[...], wq, bq)                          # (B*blocks, E) f32
    kw = proj(x_full_ref[...].reshape(B * L, E), wk, bk).reshape(B, L, E)

    # Layout-safe regroup (B*blocks, E) -> (B, blocks, E): static sublane slices +
    # leading-dim stack (avoids a non-8-aligned sublane reshape).
    qw = jnp.stack([qw2[b * blocks:(b + 1) * blocks, :] for b in range(B)], axis=0)

    w_sum = jnp.zeros((B, blocks, L), jnp.float32)
    for h in range(H):
        lo, hi = h * hd, (h + 1) * hd
        s = jnp.einsum('bqd,bkd->bqk', qw[..., lo:hi], kw[..., lo:hi],
                       preferred_element_type=jnp.float32)          # (B, blocks, L)
        s = s - jnp.max(s, axis=-1, keepdims=True)
        p = jnp.exp(s)
        w_sum = w_sum + p * pl.reciprocal(jnp.sum(p, axis=-1, keepdims=True))
    attw_ref[...] = (w_sum * (1.0 / H)).astype(attw_ref.dtype)


def parallel_mha(x_lbe, w_in_t, b_in, w_out_t, b_out, *, num_heads, num_experts):
    """x_lbe: [L, B, E] (PyTorch seq-first).

    Returns (out [L, B, E], attn_weights [B, num_experts*blocks, L]) matching
    ParallelMultiheadAttention.forward with the default nn.MultiheadAttention call.
    """
    L, B, E = x_lbe.shape
    assert B % num_experts == 0, "batch must be divisible by num_experts"
    blocks = B // num_experts
    assert num_experts * blocks <= L, "query-row slices must fit in the sequence"
    hd = E // num_heads

    # Fold the 1/sqrt(head_dim) query scale into the Q columns of the in-projection
    # (weight prep; removes a per-step VALU multiply on the activations).
    scale = 1.0 / (float(hd) ** 0.5)
    w_in_t = w_in_t.at[..., 0:E].multiply(scale)
    b_in = b_in.at[..., 0:E].multiply(scale)

    # Kernel layout: [B, L, E] so all in-kernel contractions are flat 2-D matmuls or
    # leading-batch-dim einsums (no in-kernel transposes).
    x_ble = jnp.transpose(x_lbe, (1, 0, 2))
    # Per-expert query-position slices, gathered once in XLA: (NEXP, B*blocks, E),
    # where row b*blocks + j of expert e is x[b, e*blocks + j, :].
    x_q = x_ble[:, :num_experts * blocks, :].reshape(B, num_experts, blocks, E)
    x_q = jnp.transpose(x_q, (1, 0, 2, 3)).reshape(num_experts, B * blocks, E)

    kernel = functools.partial(_parallel_mha_kernel, num_heads=num_heads, blocks=blocks)

    out_ble, attw_e = pl.pallas_call(
        kernel,
        out_shape=(
            jax.ShapeDtypeStruct((B, L, E), x_lbe.dtype),
            jax.ShapeDtypeStruct((num_experts, B, blocks, L), jnp.float32),
        ),
        grid_spec=pltpu.PrefetchScalarGridSpec(
            num_scalar_prefetch=0,
            grid=(num_experts,),
            in_specs=[
                pl.BlockSpec((B, L, E), lambda e: (0, 0, 0)),                # x, resident
                pl.BlockSpec((blocks, L, E), lambda e: (e, 0, 0)),           # expert batch slice
                pl.BlockSpec((None, B * blocks, E), lambda e: (e, 0, 0)),    # expert query slice
                pl.BlockSpec((None, E, 3 * E), lambda e: (e, 0, 0)),         # in_proj weight.T
                pl.BlockSpec((None, 1, 3 * E), lambda e: (e, 0, 0)),         # in_proj bias
                pl.BlockSpec((None, E, E), lambda e: (e, 0, 0)),             # out_proj weight.T
                pl.BlockSpec((None, 1, E), lambda e: (e, 0, 0)),             # out_proj bias
            ],
            out_specs=[
                pl.BlockSpec((blocks, L, E), lambda e: (e, 0, 0)),           # disjoint batch blocks
                pl.BlockSpec((None, B, blocks, L), lambda e: (e, 0, 0, 0)),  # disjoint query blocks
            ],
        ),
        compiler_params=pltpu.CompilerParams(
            dimension_semantics=("parallel",),
            vmem_limit_bytes=32 * 1024 * 1024),
    )(x_ble, x_ble, x_q, w_in_t, b_in, w_out_t, b_out)

    out_lbe = jnp.transpose(out_ble, (1, 0, 2))                              # (L, B, E)
    attw = jnp.transpose(attw_e, (1, 0, 2, 3)).reshape(B, num_experts * blocks, L)
    return out_lbe, attw


def _reference(x_lbe, w_in_t, b_in, w_out_t, b_out, *, num_heads, num_experts):
    """Pure-JAX reference mirroring F.multi_head_attention_forward per expert."""
    L, B, E = x_lbe.shape
    hd = E // num_heads
    outs, ws = [], []
    for e in range(num_experts):
        qkv = jnp.einsum('lbe,ef->lbf', x_lbe, w_in_t[e]) + b_in[e, 0]
        q, k, v = qkv[..., :E], qkv[..., E:2 * E], qkv[..., 2 * E:]
        q = q.reshape(L, B, num_heads, hd).transpose(1, 2, 0, 3) * (hd ** -0.5)
        k = k.reshape(L, B, num_heads, hd).transpose(1, 2, 0, 3)
        v = v.reshape(L, B, num_heads, hd).transpose(1, 2, 0, 3)
        s = jnp.einsum('bhld,bhsd->bhls', q, k)
        p = jax.nn.softmax(s, axis=-1)
        o = jnp.einsum('bhls,bhsd->bhld', p, v).transpose(2, 0, 1, 3).reshape(L, B, E)
        o = jnp.einsum('lbe,ef->lbf', o, w_out_t[e]) + b_out[e, 0]
        outs.append(o)
        ws.append(p.mean(axis=1))  # (B, L, S) head-averaged
    blocks = B // num_experts
    out_c = jnp.concatenate([outs[e][:, e * blocks:(e + 1) * blocks] for e in range(num_experts)], axis=1)
    w_c = jnp.concatenate([ws[e][:, e * blocks:(e + 1) * blocks] for e in range(num_experts)], axis=1)
    return out_c, w_c


if __name__ == "__main__":
    # Small shapes: seq L=8, batch B=6, embed E=32, heads H=4, num_experts=3.
    L, B, E, H, NEXP = 8, 6, 32, 4, 3
    assert B % NEXP == 0 and NEXP * (B // NEXP) <= L

    key = jax.random.PRNGKey(0)
    kx, kwi, kbi, kwo, kbo = jax.random.split(key, 5)

    x = jax.random.normal(kx, (L, B, E), dtype=jnp.float32)

    # Deterministic parameters, one set per expert (nn.MultiheadAttention shapes:
    # in_proj_weight (3E, E), in_proj_bias (3E,), out_proj (E, E) + (E,)).
    # NOTE: the PyTorch module deepcopies one MHA, so experts start identical; distinct
    # deterministic weights per expert exercise the same forward semantics.
    w_in = jax.random.normal(kwi, (NEXP, 3 * E, E), dtype=jnp.float32) * 0.05
    b_in = jax.random.normal(kbi, (NEXP, 1, 3 * E), dtype=jnp.float32) * 0.05
    w_out = jax.random.normal(kwo, (NEXP, E, E), dtype=jnp.float32) * 0.05
    b_out = jax.random.normal(kbo, (NEXP, 1, E), dtype=jnp.float32) * 0.05

    # Pre-transpose projection weights for the kernel (x @ W.T == x @ W_t).
    w_in_t = jnp.transpose(w_in, (0, 2, 1))    # (NEXP, E, 3E)
    w_out_t = jnp.transpose(w_out, (0, 2, 1))  # (NEXP, E, E)

    out, attw = parallel_mha(x, w_in_t, b_in, w_out_t, b_out,
                             num_heads=H, num_experts=NEXP)
    jax.block_until_ready(out)
    jax.block_until_ready(attw)

    ref_out, ref_w = _reference(x, w_in_t, b_in, w_out_t, b_out,
                                num_heads=H, num_experts=NEXP)

    blocks = B // NEXP
    assert out.shape == (L, B, E), out.shape
    assert attw.shape == (B, NEXP * blocks, L), attw.shape
    np.testing.assert_allclose(np.asarray(out), np.asarray(ref_out), rtol=1e-5, atol=1e-5)
    np.testing.assert_allclose(np.asarray(attw), np.asarray(ref_w), rtol=1e-5, atol=1e-5)

    print("KERNEL_OK")
</pallas_src>

<mosaic_0001>
module attributes {stable_mosaic.version = 11 : i64} {
  func.func @_parallel_mha_kernel(%arg0: i32, %arg1: memref<6x8x32xf32, #tpu.memory_space<vmem>>, %arg2: memref<2x8x32xf32, #tpu.memory_space<vmem>>, %arg3: memref<1x12x32xf32, #tpu.memory_space<vmem>>, %arg4: memref<1x32x96xf32, #tpu.memory_space<vmem>>, %arg5: memref<1x1x96xf32, #tpu.memory_space<vmem>>, %arg6: memref<1x32x32xf32, #tpu.memory_space<vmem>>, %arg7: memref<1x1x32xf32, #tpu.memory_space<vmem>>, %arg8: memref<2x8x32xf32, #tpu.memory_space<vmem>>, %arg9: memref<1x6x2x8xf32, #tpu.memory_space<vmem>>) attributes {dimension_semantics = [#tpu.dimension_semantics<parallel>], iteration_bounds = array<i64: 3>, scalar_prefetch = 0 : i64, scratch_operands = 0 : i64, tpu.core_type = #tpu.core_type<tc>, window_params = [{pipeline_mode = #tpu.pipeline_mode<synchronous>, transform_indices = @transform_0, window_bounds = array<i64: 6, 8, 32>}, {transform_indices = @transform_1, window_bounds = array<i64: 2, 8, 32>}, {transform_indices = @transform_2, window_bounds = array<i64: 1, 12, 32>}, {transform_indices = @transform_3, window_bounds = array<i64: 1, 32, 96>}, {transform_indices = @transform_4, window_bounds = array<i64: 1, 1, 96>}, {transform_indices = @transform_5, window_bounds = array<i64: 1, 32, 32>}, {transform_indices = @transform_6, window_bounds = array<i64: 1, 1, 32>}, {transform_indices = @transform_7, window_bounds = array<i64: 2, 8, 32>}, {transform_indices = @transform_8, window_bounds = array<i64: 1, 6, 2, 8>}]} {
    %c0 = arith.constant 0 : index
    %c0_0 = arith.constant 0 : index
    %c0_1 = arith.constant 0 : index
    %0 = vector.load %arg4[%c0, %c0_0, %c0_1] : memref<1x32x96xf32, #tpu.memory_space<vmem>>, vector<1x32x96xf32>
    %1 = vector.shape_cast %0 : vector<1x32x96xf32> to vector<32x96xf32>
    %c0_2 = arith.constant 0 : index
    %c0_3 = arith.constant 0 : index
    %c0_4 = arith.constant 0 : index
    %2 = vector.load %arg5[%c0_2, %c0_3, %c0_4] : memref<1x1x96xf32, #tpu.memory_space<vmem>>, vector<1x1x96xf32>
    %3 = vector.shape_cast %2 : vector<1x1x96xf32> to vector<1x96xf32>
    %c0_5 = arith.constant 0 : index
    %c0_6 = arith.constant 0 : index
    %c0_7 = arith.constant 0 : index
    %4 = vector.load %arg6[%c0_5, %c0_6, %c0_7] : memref<1x32x32xf32, #tpu.memory_space<vmem>>, vector<1x32x32xf32>
    %5 = vector.shape_cast %4 : vector<1x32x32xf32> to vector<32x32xf32>
    %c0_8 = arith.constant 0 : index
    %c0_9 = arith.constant 0 : index
    %c0_10 = arith.constant 0 : index
    %6 = vector.load %arg7[%c0_8, %c0_9, %c0_10] : memref<1x1x32xf32, #tpu.memory_space<vmem>>, vector<1x1x32xf32>
    %7 = vector.shape_cast %6 : vector<1x1x32xf32> to vector<1x32xf32>
    %8 = vector.extract_strided_slice %1 {offsets = [0, 0], sizes = [32, 32], strides = [1, 1]} : vector<32x96xf32> to vector<32x32xf32>
    %9 = vector.extract_strided_slice %1 {offsets = [0, 32], sizes = [32, 32], strides = [1, 1]} : vector<32x96xf32> to vector<32x32xf32>
    %10 = vector.extract_strided_slice %1 {offsets = [0, 64], sizes = [32, 32], strides = [1, 1]} : vector<32x96xf32> to vector<32x32xf32>
    %11 = vector.extract_strided_slice %3 {offsets = [0, 0], sizes = [1, 32], strides = [1, 1]} : vector<1x96xf32> to vector<1x32xf32>
    %12 = vector.extract_strided_slice %3 {offsets = [0, 32], sizes = [1, 32], strides = [1, 1]} : vector<1x96xf32> to vector<1x32xf32>
    %13 = vector.extract_strided_slice %3 {offsets = [0, 64], sizes = [1, 32], strides = [1, 1]} : vector<1x96xf32> to vector<1x32xf32>
    %c0_11 = arith.constant 0 : index
    %c0_12 = arith.constant 0 : index
    %c0_13 = arith.constant 0 : index
    %14 = vector.load %arg2[%c0_11, %c0_12, %c0_13] : memref<2x8x32xf32, #tpu.memory_space<vmem>>, vector<2x8x32xf32>
    %15 = vector.shape_cast %14 : vector<2x8x32xf32> to vector<16x32xf32>
    %cst = arith.constant dense<0.000000e+00> : vector<16x32xf32>
    %16 = tpu.matmul %15, %8, %cst {dimension_numbers = #tpu.dot_dimension_numbers<[1], [0], [0], [1], [0, 0, 1, 1], [], []>} : vector<16x32xf32>, vector<32x32xf32>, vector<16x32xf32> -> vector<16x32xf32>
    %17 = vector.broadcast %11 : vector<1x32xf32> to vector<16x32xf32>
    %18 = arith.addf %16, %17 : vector<16x32xf32>
    %19 = vector.shape_cast %18 : vector<16x32xf32> to vector<2x8x32xf32>
    %cst_14 = arith.constant dense<0.000000e+00> : vector<16x32xf32>
    %20 = tpu.matmul %15, %9, %cst_14 {dimension_numbers = #tpu.dot_dimension_numbers<[1], [0], [0], [1], [0, 0, 1, 1], [], []>} : vector<16x32xf32>, vector<32x32xf32>, vector<16x32xf32> -> vector<16x32xf32>
    %21 = vector.broadcast %12 : vector<1x32xf32> to vector<16x32xf32>
    %22 = arith.addf %20, %21 : vector<16x32xf32>
    %23 = vector.shape_cast %22 : vector<16x32xf32> to vector<2x8x32xf32>
    %cst_15 = arith.constant dense<0.000000e+00> : vector<16x32xf32>
    %24 = tpu.matmul %15, %10, %cst_15 {dimension_numbers = #tpu.dot_dimension_numbers<[1], [0], [0], [1], [0, 0, 1, 1], [], []>} : vector<16x32xf32>, vector<32x32xf32>, vector<16x32xf32> -> vector<16x32xf32>
    %25 = vector.broadcast %13 : vector<1x32xf32> to vector<16x32xf32>
    %26 = arith.addf %24, %25 : vector<16x32xf32>
    %27 = vector.shape_cast %26 : vector<16x32xf32> to vector<2x8x32xf32>
    %cst_16 = arith.constant 0.000000e+00 : f32
    %28 = vector.broadcast %cst_16 : f32 to vector<16x32xf32>
    %29 = vector.extract_strided_slice %19 {offsets = [0, 0, 0], sizes = [2, 8, 8], strides = [1, 1, 1]} : vector<2x8x32xf32> to vector<2x8x8xf32>
    %30 = vector.extract_strided_slice %23 {offsets = [0, 0, 0], sizes = [2, 8, 8], strides = [1, 1, 1]} : vector<2x8x32xf32> to vector<2x8x8xf32>
    "tpu.trace_start"() <{level = 10 : i32, message = "bqd,bkd->bqk"}> : () -> ()
    %cst_17 = arith.constant dense<0.000000e+00> : vector<2x8x8xf32>
    %31 = tpu.matmul %29, %30, %cst_17 {dimension_numbers = #tpu.dot_dimension_numbers<[2], [2], [1], [1], [0, 0, 0, 1, 1, 1], [0], [0]>} : vector<2x8x8xf32>, vector<2x8x8xf32>, vector<2x8x8xf32> -> vector<2x8x8xf32>
    "tpu.trace_stop"() : () -> ()
    %cst_18 = arith.constant dense<0xFF800000> : vector<2x8xf32>
    %32 = vector.multi_reduction <maximumf>, %31, %cst_18 [2] : vector<2x8x8xf32> to vector<2x8xf32>
    %33 = vector.shape_cast %32 : vector<2x8xf32> to vector<2x8x1xf32>
    %34 = vector.broadcast %33 : vector<2x8x1xf32> to vector<2x8x8xf32>
    %35 = arith.subf %31, %34 : vector<2x8x8xf32>
    %36 = math.exp %35 : vector<2x8x8xf32>
    %cst_19 = arith.constant dense<0.000000e+00> : vector<2x8xf32>
    %37 = vector.multi_reduction <add>, %36, %cst_19 [2] : vector<2x8x8xf32> to vector<2x8xf32>
    %38 = vector.shape_cast %37 : vector<2x8xf32> to vector<2x8x1xf32>
    %39 = tpu.reciprocal %38 : vector<2x8x1xf32> -> vector<2x8x1xf32>
    %40 = vector.broadcast %39 : vector<2x8x1xf32> to vector<2x8x8xf32>
    %41 = arith.mulf %36, %40 : vector<2x8x8xf32>
    %42 = vector.extract_strided_slice %27 {offsets = [0, 0, 0], sizes = [2, 8, 8], strides = [1, 1, 1]} : vector<2x8x32xf32> to vector<2x8x8xf32>
    "tpu.trace_start"() <{level = 10 : i32, message = "bqk,bkd->bqd"}> : () -> ()
    %cst_20 = arith.constant dense<0.000000e+00> : vector<2x8x8xf32>
    %43 = tpu.matmul %41, %42, %cst_20 {dimension_numbers = #tpu.dot_dimension_numbers<[2], [1], [1], [2], [0, 0, 0, 1, 1, 2], [0], [0]>} : vector<2x8x8xf32>, vector<2x8x8xf32>, vector<2x8x8xf32> -> vector<2x8x8xf32>
    "tpu.trace_stop"() : () -> ()
    %44 = vector.shape_cast %43 : vector<2x8x8xf32> to vector<16x8xf32>
    %45 = vector.extract_strided_slice %5 {offsets = [0, 0], sizes = [8, 32], strides = [1, 1]} : vector<32x32xf32> to vector<8x32xf32>
    %cst_21 = arith.constant dense<0.000000e+00> : vector<16x32xf32>
    %46 = tpu.matmul %44, %45, %cst_21 {dimension_numbers = #tpu.dot_dimension_numbers<[1], [0], [0], [1], [0, 0, 1, 1], [], []>} : vector<16x8xf32>, vector<8x32xf32>, vector<16x32xf32> -> vector<16x32xf32>
    %47 = arith.addf %28, %46 : vector<16x32xf32>
    %48 = vector.extract_strided_slice %19 {offsets = [0, 0, 8], sizes = [2, 8, 8], strides = [1, 1, 1]} : vector<2x8x32xf32> to vector<2x8x8xf32>
    %49 = vector.extract_strided_slice %23 {offsets = [0, 0, 8], sizes = [2, 8, 8], strides = [1, 1, 1]} : vector<2x8x32xf32> to vector<2x8x8xf32>
    "tpu.trace_start"() <{level = 10 : i32, message = "bqd,bkd->bqk"}> : () -> ()
    %cst_22 = arith.constant dense<0.000000e+00> : vector<2x8x8xf32>
    %50 = tpu.matmul %48, %49, %cst_22 {dimension_numbers = #tpu.dot_dimension_numbers<[2], [2], [1], [1], [0, 0, 0, 1, 1, 1], [0], [0]>} : vector<2x8x8xf32>, vector<2x8x8xf32>, vector<2x8x8xf32> -> vector<2x8x8xf32>
    "tpu.trace_stop"() : () -> ()
    %cst_23 = arith.constant dense<0xFF800000> : vector<2x8xf32>
    %51 = vector.multi_reduction <maximumf>, %50, %cst_23 [2] : vector<2x8x8xf32> to vector<2x8xf32>
    %52 = vector.shape_cast %51 : vector<2x8xf32> to vector<2x8x1xf32>
    %53 = vector.broadcast %52 : vector<2x8x1xf32> to vector<2x8x8xf32>
    %54 = arith.subf %50, %53 : vector<2x8x8xf32>
    %55 = math.exp %54 : vector<2x8x8xf32>
    %cst_24 = arith.constant dense<0.000000e+00> : vector<2x8xf32>
    %56 = vector.multi_reduction <add>, %55, %cst_24 [2] : vector<2x8x8xf32> to vector<2x8xf32>
    %57 = vector.shape_cast %56 : vector<2x8xf32> to vector<2x8x1xf32>
    %58 = tpu.reciprocal %57 : vector<2x8x1xf32> -> vector<2x8x1xf32>
    %59 = vector.broadcast %58 : vector<2x8x1xf32> to vector<2x8x8xf32>
    %60 = arith.mulf %55, %59 : vector<2x8x8xf32>
    %61 = vector.extract_strided_slice %27 {offsets = [0, 0, 8], sizes = [2, 8, 8], strides = [1, 1, 1]} : vector<2x8x32xf32> to vector<2x8x8xf32>
    "tpu.trace_start"() <{level = 10 : i32, message = "bqk,bkd->bqd"}> : () -> ()
    %cst_25 = arith.constant dense<0.000000e+00> : vector<2x8x8xf32>
    %62 = tpu.matmul %60, %61, %cst_25 {dimension_numbers = #tpu.dot_dimension_numbers<[2], [1], [1], [2], [0, 0, 0, 1, 1, 2], [0], [0]>} : vector<2x8x8xf32>, vector<2x8x8xf32>, vector<2x8x8xf32> -> vector<2x8x8xf32>
    "tpu.trace_stop"() : () -> ()
    %63 = vector.shape_cast %62 : vector<2x8x8xf32> to vector<16x8xf32>
    %64 = vector.extract_strided_slice %5 {offsets = [8, 0], sizes = [8, 32], strides = [1, 1]} : vector<32x32xf32> to vector<8x32xf32>
    %cst_26 = arith.constant dense<0.000000e+00> : vector<16x32xf32>
    %65 = tpu.matmul %63, %64, %cst_26 {dimension_numbers = #tpu.dot_dimension_numbers<[1], [0], [0], [1], [0, 0, 1, 1], [], []>} : vector<16x8xf32>, vector<8x32xf32>, vector<16x32xf32> -> vector<16x32xf32>
    %66 = arith.addf %47, %65 : vector<16x32xf32>
    %67 = vector.extract_strided_slice %19 {offsets = [0, 0, 16], sizes = [2, 8, 8], strides = [1, 1, 1]} : vector<2x8x32xf32> to vector<2x8x8xf32>
    %68 = vector.extract_strided_slice %23 {offsets = [0, 0, 16], sizes = [2, 8, 8], strides = [1, 1, 1]} : vector<2x8x32xf32> to vector<2x8x8xf32>
    "tpu.trace_start"() <{level = 10 : i32, message = "bqd,bkd->bqk"}> : () -> ()
    %cst_27 = arith.constant dense<0.000000e+00> : vector<2x8x8xf32>
    %69 = tpu.matmul %67, %68, %cst_27 {dimension_numbers = #tpu.dot_dimension_numbers<[2], [2], [1], [1], [0, 0, 0, 1, 1, 1], [0], [0]>} : vector<2x8x8xf32>, vector<2x8x8xf32>, vector<2x8x8xf32> -> vector<2x8x8xf32>
    "tpu.trace_stop"() : () -> ()
    %cst_28 = arith.constant dense<0xFF800000> : vector<2x8xf32>
    %70 = vector.multi_reduction <maximumf>, %69, %cst_28 [2] : vector<2x8x8xf32> to vector<2x8xf32>
    %71 = vector.shape_cast %70 : vector<2x8xf32> to vector<2x8x1xf32>
    %72 = vector.broadcast %71 : vector<2x8x1xf32> to vector<2x8x8xf32>
    %73 = arith.subf %69, %72 : vector<2x8x8xf32>
    %74 = math.exp %73 : vector<2x8x8xf32>
    %cst_29 = arith.constant dense<0.000000e+00> : vector<2x8xf32>
    %75 = vector.multi_reduction <add>, %74, %cst_29 [2] : vector<2x8x8xf32> to vector<2x8xf32>
    %76 = vector.shape_cast %75 : vector<2x8xf32> to vector<2x8x1xf32>
    %77 = tpu.reciprocal %76 : vector<2x8x1xf32> -> vector<2x8x1xf32>
    %78 = vector.broadcast %77 : vector<2x8x1xf32> to vector<2x8x8xf32>
    %79 = arith.mulf %74, %78 : vector<2x8x8xf32>
    %80 = vector.extract_strided_slice %27 {offsets = [0, 0, 16], sizes = [2, 8, 8], strides = [1, 1, 1]} : vector<2x8x32xf32> to vector<2x8x8xf32>
    "tpu.trace_start"() <{level = 10 : i32, message = "bqk,bkd->bqd"}> : () -> ()
    %cst_30 = arith.constant dense<0.000000e+00> : vector<2x8x8xf32>
    %81 = tpu.matmul %79, %80, %cst_30 {dimension_numbers = #tpu.dot_dimension_numbers<[2], [1], [1], [2], [0, 0, 0, 1, 1, 2], [0], [0]>} : vector<2x8x8xf32>, vector<2x8x8xf32>, vector<2x8x8xf32> -> vector<2x8x8xf32>
    "tpu.trace_stop"() : () -> ()
    %82 = vector.shape_cast %81 : vector<2x8x8xf32> to vector<16x8xf32>
    %83 = vector.extract_strided_slice %5 {offsets = [16, 0], sizes = [8, 32], strides = [1, 1]} : vector<32x32xf32> to vector<8x32xf32>
    %cst_31 = arith.constant dense<0.000000e+00> : vector<16x32xf32>
    %84 = tpu.matmul %82, %83, %cst_31 {dimension_numbers = #tpu.dot_dimension_numbers<[1], [0], [0], [1], [0, 0, 1, 1], [], []>} : vector<16x8xf32>, vector<8x32xf32>, vector<16x32xf32> -> vector<16x32xf32>
    %85 = arith.addf %66, %84 : vector<16x32xf32>
    %86 = vector.extract_strided_slice %19 {offsets = [0, 0, 24], sizes = [2, 8, 8], strides = [1, 1, 1]} : vector<2x8x32xf32> to vector<2x8x8xf32>
    %87 = vector.extract_strided_slice %23 {offsets = [0, 0, 24], sizes = [2, 8, 8], strides = [1, 1, 1]} : vector<2x8x32xf32> to vector<2x8x8xf32>
    "tpu.trace_start"() <{level = 10 : i32, message = "bqd,bkd->bqk"}> : () -> ()
    %cst_32 = arith.constant dense<0.000000e+00> : vector<2x8x8xf32>
    %88 = tpu.matmul %86, %87, %cst_32 {dimension_numbers = #tpu.dot_dimension_numbers<[2], [2], [1], [1], [0, 0, 0, 1, 1, 1], [0], [0]>} : vector<2x8x8xf32>, vector<2x8x8xf32>, vector<2x8x8xf32> -> vector<2x8x8xf32>
    "tpu.trace_stop"() : () -> ()
    %cst_33 = arith.constant dense<0xFF800000> : vector<2x8xf32>
    %89 = vector.multi_reduction <maximumf>, %88, %cst_33 [2] : vector<2x8x8xf32> to vector<2x8xf32>
    %90 = vector.shape_cast %89 : vector<2x8xf32> to vector<2x8x1xf32>
    %91 = vector.broadcast %90 : vector<2x8x1xf32> to vector<2x8x8xf32>
    %92 = arith.subf %88, %91 : vector<2x8x8xf32>
    %93 = math.exp %92 : vector<2x8x8xf32>
    %cst_34 = arith.constant dense<0.000000e+00> : vector<2x8xf32>
    %94 = vector.multi_reduction <add>, %93, %cst_34 [2] : vector<2x8x8xf32> to vector<2x8xf32>
    %95 = vector.shape_cast %94 : vector<2x8xf32> to vector<2x8x1xf32>
    %96 = tpu.reciprocal %95 : vector<2x8x1xf32> -> vector<2x8x1xf32>
    %97 = vector.broadcast %96 : vector<2x8x1xf32> to vector<2x8x8xf32>
    %98 = arith.mulf %93, %97 : vector<2x8x8xf32>
    %99 = vector.extract_strided_slice %27 {offsets = [0, 0, 24], sizes = [2, 8, 8], strides = [1, 1, 1]} : vector<2x8x32xf32> to vector<2x8x8xf32>
    "tpu.trace_start"() <{level = 10 : i32, message = "bqk,bkd->bqd"}> : () -> ()
    %cst_35 = arith.constant dense<0.000000e+00> : vector<2x8x8xf32>
    %100 = tpu.matmul %98, %99, %cst_35 {dimension_numbers = #tpu.dot_dimension_numbers<[2], [1], [1], [2], [0, 0, 0, 1, 1, 2], [0], [0]>} : vector<2x8x8xf32>, vector<2x8x8xf32>, vector<2x8x8xf32> -> vector<2x8x8xf32>
    "tpu.trace_stop"() : () -> ()
    %101 = vector.shape_cast %100 : vector<2x8x8xf32> to vector<16x8xf32>
    %102 = vector.extract_strided_slice %5 {offsets = [24, 0], sizes = [8, 32], strides = [1, 1]} : vector<32x32xf32> to vector<8x32xf32>
    %cst_36 = arith.constant dense<0.000000e+00> : vector<16x32xf32>
    %103 = tpu.matmul %101, %102, %cst_36 {dimension_numbers = #tpu.dot_dimension_numbers<[1], [0], [0], [1], [0, 0, 1, 1], [], []>} : vector<16x8xf32>, vector<8x32xf32>, vector<16x32xf32> -> vector<16x32xf32>
    %104 = arith.addf %85, %103 : vector<16x32xf32>
    %105 = vector.broadcast %7 : vector<1x32xf32> to vector<16x32xf32>
    %106 = arith.addf %104, %105 : vector<16x32xf32>
    %107 = vector.shape_cast %106 : vector<16x32xf32> to vector<2x8x32xf32>
    %c0_37 = arith.constant 0 : index
    %c0_38 = arith.constant 0 : index
    %c0_39 = arith.constant 0 : index
    %108 = vector.load %arg8[%c0_37, %c0_38, %c0_39] : memref<2x8x32xf32, #tpu.memory_space<vmem>>, vector<2x8x32xf32>
    tpu.vector_store %arg8[%c0_37, %c0_38, %c0_39], %107 {strides = array<i32>} : memref<2x8x32xf32, #tpu.memory_space<vmem>>, vector<2x8x32xf32>,
    %c0_40 = arith.constant 0 : index
    %c0_41 = arith.constant 0 : index
    %c0_42 = arith.constant 0 : index
    %109 = vector.load %arg3[%c0_40, %c0_41, %c0_42] : memref<1x12x32xf32, #tpu.memory_space<vmem>>, vector<1x12x32xf32>
    %110 = vector.shape_cast %109 : vector<1x12x32xf32> to vector<12x32xf32>
    %cst_43 = arith.constant dense<0.000000e+00> : vector<12x32xf32>
    %111 = tpu.matmul %110, %8, %cst_43 {dimension_numbers = #tpu.dot_dimension_numbers<[1], [0], [0], [1], [0, 0, 1, 1], [], []>} : vector<12x32xf32>, vector<32x32xf32>, vector<12x32xf32> -> vector<12x32xf32>
    %112 = vector.broadcast %11 : vector<1x32xf32> to vector<12x32xf32>
    %113 = arith.addf %111, %112 : vector<12x32xf32>
    %c0_44 = arith.constant 0 : index
    %c0_45 = arith.constant 0 : index
    %c0_46 = arith.constant 0 : index
    %114 = vector.load %arg1[%c0_44, %c0_45, %c0_46] : memref<6x8x32xf32, #tpu.memory_space<vmem>>, vector<6x8x32xf32>
    %115 = vector.shape_cast %114 : vector<6x8x32xf32> to vector<48x32xf32>
    %cst_47 = arith.constant dense<0.000000e+00> : vector<48x32xf32>
    %116 = tpu.matmul %115, %9, %cst_47 {dimension_numbers = #tpu.dot_dimension_numbers<[1], [0], [0], [1], [0, 0, 1, 1], [], []>} : vector<48x32xf32>, vector<32x32xf32>, vector<48x32xf32> -> vector<48x32xf32>
    %117 = vector.broadcast %12 : vector<1x32xf32> to vector<48x32xf32>
    %118 = arith.addf %116, %117 : vector<48x32xf32>
    %119 = vector.shape_cast %118 : vector<48x32xf32> to vector<6x8x32xf32>
    %120 = vector.extract_strided_slice %113 {offsets = [0, 0], sizes = [2, 32], strides = [1, 1]} : vector<12x32xf32> to vector<2x32xf32>
    %121 = vector.extract_strided_slice %113 {offsets = [2, 0], sizes = [2, 32], strides = [1, 1]} : vector<12x32xf32> to vector<2x32xf32>
    %122 = vector.extract_strided_slice %113 {offsets = [4, 0], sizes = [2, 32], strides = [1, 1]} : vector<12x32xf32> to vector<2x32xf32>
    %123 = vector.extract_strided_slice %113 {offsets = [6, 0], sizes = [2, 32], strides = [1, 1]} : vector<12x32xf32> to vector<2x32xf32>
    %124 = vector.extract_strided_slice %113 {offsets = [8, 0], sizes = [2, 32], strides = [1, 1]} : vector<12x32xf32> to vector<2x32xf32>
    %125 = vector.extract_strided_slice %113 {offsets = [10, 0], sizes = [2, 32], strides = [1, 1]} : vector<12x32xf32> to vector<2x32xf32>
    %126 = vector.shape_cast %120 : vector<2x32xf32> to vector<1x2x32xf32>
    %127 = vector.shape_cast %121 : vector<2x32xf32> to vector<1x2x32xf32>
    %128 = vector.shape_cast %122 : vector<2x32xf32> to vector<1x2x32xf32>
    %129 = vector.shape_cast %123 : vector<2x32xf32> to vector<1x2x32xf32>
    %130 = vector.shape_cast %124 : vector<2x32xf32> to vector<1x2x32xf32>
    %131 = vector.shape_cast %125 : vector<2x32xf32> to vector<1x2x32xf32>
    %132 = tpu.concatenate %126, %127, %128, %129, %130, %131 in 0 : vector<1x2x32xf32>, vector<1x2x32xf32>, vector<1x2x32xf32>, vector<1x2x32xf32>, vector<1x2x32xf32>, vector<1x2x32xf32> -> vector<6x2x32xf32>
    %cst_48 = arith.constant 0.000000e+00 : f32
    %133 = vector.broadcast %cst_48 : f32 to vector<6x2x8xf32>
    %134 = vector.extract_strided_slice %132 {offsets = [0, 0, 0], sizes = [6, 2, 8], strides = [1, 1, 1]} : vector<6x2x32xf32> to vector<6x2x8xf32>
    %135 = vector.extract_strided_slice %119 {offsets = [0, 0, 0], sizes = [6, 8, 8], strides = [1, 1, 1]} : vector<6x8x32xf32> to vector<6x8x8xf32>
    "tpu.trace_start"() <{level = 10 : i32, message = "bqd,bkd->bqk"}> : () -> ()
    %cst_49 = arith.constant dense<0.000000e+00> : vector<6x2x8xf32>
    %136 = tpu.matmul %134, %135, %cst_49 {dimension_numbers = #tpu.dot_dimension_numbers<[2], [2], [1], [1], [0, 0, 0, 1, 1, 1], [0], [0]>} : vector<6x2x8xf32>, vector<6x8x8xf32>, vector<6x2x8xf32> -> vector<6x2x8xf32>
    "tpu.trace_stop"() : () -> ()
    %cst_50 = arith.constant dense<0xFF800000> : vector<6x2xf32>
    %137 = vector.multi_reduction <maximumf>, %136, %cst_50 [2] : vector<6x2x8xf32> to vector<6x2xf32>
    %138 = vector.shape_cast %137 : vector<6x2xf32> to vector<6x2x1xf32>
    %139 = vector.broadcast %138 : vector<6x2x1xf32> to vector<6x2x8xf32>
    %140 = arith.subf %136, %139 : vector<6x2x8xf32>
    %141 = math.exp %140 : vector<6x2x8xf32>
    %cst_51 = arith.constant dense<0.000000e+00> : vector<6x2xf32>
    %142 = vector.multi_reduction <add>, %141, %cst_51 [2] : vector<6x2x8xf32> to vector<6x2xf32>
    %143 = vector.shape_cast %142 : vector<6x2xf32> to vector<6x2x1xf32>
    %144 = tpu.reciprocal %143 : vector<6x2x1xf32> -> vector<6x2x1xf32>
    %145 = vector.broadcast %144 : vector<6x2x1xf32> to vector<6x2x8xf32>
    %146 = arith.mulf %141, %145 : vector<6x2x8xf32>
    %147 = arith.addf %133, %146 : vector<6x2x8xf32>
    %148 = vector.extract_strided_slice %132 {offsets = [0, 0, 8], sizes = [6, 2, 8], strides = [1, 1, 1]} : vector<6x2x32xf32> to vector<6x2x8xf32>
    %149 = vector.extract_strided_slice %119 {offsets = [0, 0, 8], sizes = [6, 8, 8], strides = [1, 1, 1]} : vector<6x8x32xf32> to vector<6x8x8xf32>
    "tpu.trace_start"() <{level = 10 : i32, message = "bqd,bkd->bqk"}> : () -> ()
    %cst_52 = arith.constant dense<0.000000e+00> : vector<6x2x8xf32>
    %150 = tpu.matmul %148, %149, %cst_52 {dimension_numbers = #tpu.dot_dimension_numbers<[2], [2], [1], [1], [0, 0, 0, 1, 1, 1], [0], [0]>} : vector<6x2x8xf32>, vector<6x8x8xf32>, vector<6x2x8xf32> -> vector<6x2x8xf32>
    "tpu.trace_stop"() : () -> ()
    %cst_53 = arith.constant dense<0xFF800000> : vector<6x2xf32>
    %151 = vector.multi_reduction <maximumf>, %150, %cst_53 [2] : vector<6x2x8xf32> to vector<6x2xf32>
    %152 = vector.shape_cast %151 : vector<6x2xf32> to vector<6x2x1xf32>
    %153 = vector.broadcast %152 : vector<6x2x1xf32> to vector<6x2x8xf32>
    %154 = arith.subf %150, %153 : vector<6x2x8xf32>
    %155 = math.exp %154 : vector<6x2x8xf32>
    %cst_54 = arith.constant dense<0.000000e+00> : vector<6x2xf32>
    %156 = vector.multi_reduction <add>, %155, %cst_54 [2] : vector<6x2x8xf32> to vector<6x2xf32>
    %157 = vector.shape_cast %156 : vector<6x2xf32> to vector<6x2x1xf32>
    %158 = tpu.reciprocal %157 : vector<6x2x1xf32> -> vector<6x2x1xf32>
    %159 = vector.broadcast %158 : vector<6x2x1xf32> to vector<6x2x8xf32>
    %160 = arith.mulf %155, %159 : vector<6x2x8xf32>
    %161 = arith.addf %147, %160 : vector<6x2x8xf32>
    %162 = vector.extract_strided_slice %132 {offsets = [0, 0, 16], sizes = [6, 2, 8], strides = [1, 1, 1]} : vector<6x2x32xf32> to vector<6x2x8xf32>
    %163 = vector.extract_strided_slice %119 {offsets = [0, 0, 16], sizes = [6, 8, 8], strides = [1, 1, 1]} : vector<6x8x32xf32> to vector<6x8x8xf32>
    "tpu.trace_start"() <{level = 10 : i32, message = "bqd,bkd->bqk"}> : () -> ()
    %cst_55 = arith.constant dense<0.000000e+00> : vector<6x2x8xf32>
    %164 = tpu.matmul %162, %163, %cst_55 {dimension_numbers = #tpu.dot_dimension_numbers<[2], [2], [1], [1], [0, 0, 0, 1, 1, 1], [0], [0]>} : vector<6x2x8xf32>, vector<6x8x8xf32>, vector<6x2x8xf32> -> vector<6x2x8xf32>
    "tpu.trace_stop"() : () -> ()
    %cst_56 = arith.constant dense<0xFF800000> : vector<6x2xf32>
    %165 = vector.multi_reduction <maximumf>, %164, %cst_56 [2] : vector<6x2x8xf32> to vector<6x2xf32>
    %166 = vector.shape_cast %165 : vector<6x2xf32> to vector<6x2x1xf32>
    %167 = vector.broadcast %166 : vector<6x2x1xf32> to vector<6x2x8xf32>
    %168 = arith.subf %164, %167 : vector<6x2x8xf32>
    %169 = math.exp %168 : vector<6x2x8xf32>
    %cst_57 = arith.constant dense<0.000000e+00> : vector<6x2xf32>
    %170 = vector.multi_reduction <add>, %169, %cst_57 [2] : vector<6x2x8xf32> to vector<6x2xf32>
    %171 = vector.shape_cast %170 : vector<6x2xf32> to vector<6x2x1xf32>
    %172 = tpu.reciprocal %171 : vector<6x2x1xf32> -> vector<6x2x1xf32>
    %173 = vector.broadcast %172 : vector<6x2x1xf32> to vector<6x2x8xf32>
    %174 = arith.mulf %169, %173 : vector<6x2x8xf32>
    %175 = arith.addf %161, %174 : vector<6x2x8xf32>
    %176 = vector.extract_strided_slice %132 {offsets = [0, 0, 24], sizes = [6, 2, 8], strides = [1, 1, 1]} : vector<6x2x32xf32> to vector<6x2x8xf32>
    %177 = vector.extract_strided_slice %119 {offsets = [0, 0, 24], sizes = [6, 8, 8], strides = [1, 1, 1]} : vector<6x8x32xf32> to vector<6x8x8xf32>
    "tpu.trace_start"() <{level = 10 : i32, message = "bqd,bkd->bqk"}> : () -> ()
    %cst_58 = arith.constant dense<0.000000e+00> : vector<6x2x8xf32>
    %178 = tpu.matmul %176, %177, %cst_58 {dimension_numbers = #tpu.dot_dimension_numbers<[2], [2], [1], [1], [0, 0, 0, 1, 1, 1], [0], [0]>} : vector<6x2x8xf32>, vector<6x8x8xf32>, vector<6x2x8xf32> -> vector<6x2x8xf32>
    "tpu.trace_stop"() : () -> ()
    %cst_59 = arith.constant dense<0xFF800000> : vector<6x2xf32>
    %179 = vector.multi_reduction <maximumf>, %178, %cst_59 [2] : vector<6x2x8xf32> to vector<6x2xf32>
    %180 = vector.shape_cast %179 : vector<6x2xf32> to vector<6x2x1xf32>
    %181 = vector.broadcast %180 : vector<6x2x1xf32> to vector<6x2x8xf32>
    %182 = arith.subf %178, %181 : vector<6x2x8xf32>
    %183 = math.exp %182 : vector<6x2x8xf32>
    %cst_60 = arith.constant dense<0.000000e+00> : vector<6x2xf32>
    %184 = vector.multi_reduction <add>, %183, %cst_60 [2] : vector<6x2x8xf32> to vector<6x2xf32>
    %185 = vector.shape_cast %184 : vector<6x2xf32> to vector<6x2x1xf32>
    %186 = tpu.reciprocal %185 : vector<6x2x1xf32> -> vector<6x2x1xf32>
    %187 = vector.broadcast %186 : vector<6x2x1xf32> to vector<6x2x8xf32>
    %188 = arith.mulf %183, %187 : vector<6x2x8xf32>
    %189 = arith.addf %175, %188 : vector<6x2x8xf32>
    %cst_61 = arith.constant 2.500000e-01 : f32
    %190 = vector.broadcast %cst_61 : f32 to vector<6x2x8xf32>
    %191 = arith.mulf %189, %190 : vector<6x2x8xf32>
    %c0_62 = arith.constant 0 : index
    %c0_63 = arith.constant 0 : index
    %c0_64 = arith.constant 0 : index
    %c0_65 = arith.constant 0 : index
    %192 = vector.load %arg9[%c0_62, %c0_63, %c0_64, %c0_65] : memref<1x6x2x8xf32, #tpu.memory_space<vmem>>, vector<1x6x2x8xf32>
    %193 = vector.shape_cast %192 : vector<1x6x2x8xf32> to vector<6x2x8xf32>
    %194 = vector.shape_cast %191 : vector<6x2x8xf32> to vector<1x6x2x8xf32>
    tpu.vector_store %arg9[%c0_62, %c0_63, %c0_64, %c0_65], %194 {strides = array<i32>} : memref<1x6x2x8xf32, #tpu.memory_space<vmem>>, vector<1x6x2x8xf32>,
    return
  }
  func.func @transform_0(%arg0: i32) -> (i32, i32, i32) {
    %c0_i32 = arith.constant 0 : i32
    %c0_i32_0 = arith.constant 0 : i32
    %c0_i32_1 = arith.constant 0 : i32
    %c0_i32_2 = arith.constant 0 : i32
    return %c0_i32, %c0_i32_0, %c0_i32_1 : i32, i32, i32
  }
  func.func @transform_1(%arg0: i32) -> (i32, i32, i32) {
    %c0_i32 = arith.constant 0 : i32
    %c0_i32_0 = arith.constant 0 : i32
    %c0_i32_1 = arith.constant 0 : i32
    return %arg0, %c0_i32, %c0_i32_0 : i32, i32, i32
  }
  func.func @transform_2(%arg0: i32) -> (i32, i32, i32) {
    %c0_i32 = arith.constant 0 : i32
    %c0_i32_0 = arith.constant 0 : i32
    %c0_i32_1 = arith.constant 0 : i32
    return %arg0, %c0_i32, %c0_i32_0 : i32, i32, i32
  }
  func.func @transform_3(%arg0: i32) -> (i32, i32, i32) {
    %c0_i32 = arith.constant 0 : i32
    %c0_i32_0 = arith.constant 0 : i32
    %c0_i32_1 = arith.constant 0 : i32
    return %arg0, %c0_i32, %c0_i32_0 : i32, i32, i32
  }
  func.func @transform_4(%arg0: i32) -> (i32, i32, i32) {
    %c0_i32 = arith.constant 0 : i32
    %c0_i32_0 = arith.constant 0 : i32
    %c0_i32_1 = arith.constant 0 : i32
    return %arg0, %c0_i32, %c0_i32_0 : i32, i32, i32
  }
  func.func @transform_5(%arg0: i32) -> (i32, i32, i32) {
    %c0_i32 = arith.constant 0 : i32
    %c0_i32_0 = arith.constant 0 : i32
    %c0_i32_1 = arith.constant 0 : i32
    return %arg0, %c0_i32, %c0_i32_0 : i32, i32, i32
  }
  func.func @transform_6(%arg0: i32) -> (i32, i32, i32) {
    %c0_i32 = arith.constant 0 : i32
    %c0_i32_0 = arith.constant 0 : i32
    %c0_i32_1 = arith.constant 0 : i32
    return %arg0, %c0_i32, %c0_i32_0 : i32, i32, i32
  }
  func.func @transform_7(%arg0: i32) -> (i32, i32, i32) {
    %c0_i32 = arith.constant 0 : i32
    %c0_i32_0 = arith.constant 0 : i32
    %c0_i32_1 = arith.constant 0 : i32
    return %arg0, %c0_i32, %c0_i32_0 : i32, i32, i32
  }
  func.func @transform_8(%arg0: i32) -> (i32, i32, i32, i32) {
    %c0_i32 = arith.constant 0 : i32
    %c0_i32_0 = arith.constant 0 : i32
    %c0_i32_1 = arith.constant 0 : i32
    %c0_i32_2 = arith.constant 0 : i32
    return %arg0, %c0_i32, %c0_i32_0, %c0_i32_1 : i32, i32, i32, i32
  }
}

</mosaic_0001>

<bundles_post_ra>
// kernel: tpu_custom_call.1
= control target key start
LH: loop header
LB: loop body
LE: loop exit
PB: predicated region body
PF: predicated region fallthrough
CT: control target
= control target key end

     0   :  { %s7264_s0 = inlined_call_operand.hbm [shape: f32[6,8,32], index: 0, kind: input, shape index: {}]   ;;  %s7265_s1 = inlined_call_operand.hbm [shape: f32[6,8,32], index: 1, kind: input, shape index: {}]   ;;  %s7266_s2 = inlined_call_operand.hbm [shape: f32[3,12,32], index: 2, kind: input, shape index: {}]   ;;  %s7267_s3 = inlined_call_operand.hbm [shape: f32[3,32,96], index: 3, kind: input, shape index: {}]   ;;  %s7268_s4 = inlined_call_operand.vmem [shape: f32[3,1,96], index: 4, kind: input, shape index: {}]   ;;  %s7269_s5 = inlined_call_operand.hbm [shape: f32[3,32,32], index: 5, kind: input, shape index: {}]   ;;  %s7270_s6 = inlined_call_operand.vmem [shape: f32[3,1,32], index: 6, kind: input, shape index: {}]   ;;  %s7271_s7 = inlined_call_operand.hbm [shape: f32[6,8,32], index: 7, kind: output, shape index: {0}]   ;;  %s7272_s8 = inlined_call_operand.hbm [shape: f32[3,6,2,8], index: 8, kind: output, shape index: {1}]  }
   0x1   :  { %7293 = sst [smem:[#allocation25_spill]] %s7265_s1 }
   0x2   :  { %7294 = sst [smem:[#allocation26_spill]] %s7267_s3 }
   0x3   :  { %14 = vsyncpa [#allocation3], 0 }
   0x4   :  { %15 = vsyncpa [#allocation6], 0 }
   0x5   :  { %17 = vsyncpa [#allocation6 + $0x1], 0 }
   0x6   :  { %18 = vsyncpa [#allocation9], 0 }
   0x7   :  { %20 = vsyncpa [#allocation9 + $0x1], 0 }
   0x8   :  { %21 = vsyncpa [#allocation4], 0 }
   0x9   :  { %23 = vsyncpa [#allocation4 + $0x1], 0 }
   0xa   :  { %24 = vsyncpa [#allocation13], 0 }
   0xb   :  { %26 = vsyncpa [#allocation13 + $0x1], 0  ;;  %s6169_s27 = smov 0   ;;  %s6171_s28 = smov 0  }
   0xc   :  { %s6173_s29 = smov 0   ;;  %s6175_s30 = smov 0  }
   0xd LB: > { %7295 = sst [smem:[#allocation19_spill]] %s6090_s27  ;;  %s6190_s9 = sadd.s32 1, %s6102_s30   ;;  %s6102_s30 = sphi %s6175_s30, %s7329_s30   ;;  %s6098_s29 = sphi %s6173_s29, %s7331_s29   ;;  %s6094_s28 = sphi %s6171_s28, %s7333_s28   ;;  %s6090_s27 = sphi %s6169_s27, %s7332_s27  }
   0xe   : > { %7296 = sst [smem:[#allocation20_spill]] %s6098_s29  ;;  %s60_s10 = sadd.s32 1, %s6098_s29 }
   0xf   : > { %7297 = sst [smem:[#allocation21_spill]] %s6102_s30  ;;  %s57_s11 = ssub.s32 %s6102_s30, %s6190_s9 }
  0x10   : > { %7298 = sst [smem:[#allocation22_spill]] %s6190_s9  ;;  %p7273_p0 = scmp.ne.s32.totalorder %s6098_s29, %s6094_s28 }
  0x11   : > { %p58_p1 = scmp.eq.s32.totalorder %s57_s11, 0  ;;  %p68_p2 = scmp.eq.s32.totalorder %s6102_s30, 0 }
  0x12   : > { %p5651_p4 = scmp.lt.s32.totalorder %s6102_s30, 3  ;;  %s7275_s13 = sand.u32 1, %s6102_s30  }
  0x13   : > { %s6199_s12 = scalar_select %p58_p1, %s6098_s29, %s60_s10  }
  0x14   : > { %p69_p3 = por %p68_p2, %p7273_p0  ;;  %s294_s14 = sand.u32 1, %s6098_s29  }
  0x15   : > { %7299 = sst [smem:[#allocation23_spill]] %s6199_s12  ;;  %s6209_s15 = sshll.u32 %s294_s14, 4 }
  0x16   : > { %s7274_s16 = sshll.u32 %s6102_s30, 8  ;;  %s7300_s1 = sld [smem:[#allocation25_spill]] }
  0x17   : > { %s296_s20 = scalar_lea.vmem [#allocation5], %s6209_s15  ;;  %p6220_p5 = pnand %p5651_p4, %p69_p3 }
  0x18   : > { %s303_s21 = sshll.u32 %s296_s20, 4  ;;  %s6228_s23 = scalar_lea.sflag [#allocation6], %s7275_s13  ;;  %s6224_s21 = int_to_ptr.vmem [resolvable:$true] %s303_s21 }
  0x19   : > { %p6234_p7 = pneg %p6220_p5 }
  0x1c   : > { %s6217_s19 = scalar_lea.hbm %s7300_s1, %s7274_s16  ;;  %s5853_s11 = scalar_lea.hbm %s7300_s1, 768 }
  0x1d   : > { %s5848_s24 = scalar_lea.hbm %s6217_s19, 256  ;;  %p5854_p10 = scmp.lt.u32.totalorder %s6217_s19, %s7300_s1 }
  0x1e   : > { %p5849_p6 = scmp.ne.s32.totalorder %s6217_s19, %s5848_s24  ;;  %p5855_p11 = scmp.lt.u32.totalorder %s5853_s11, %s5848_s24 }
  0x1f   : > { %p5857_p13 = scmp.lt.u32.totalorder %s5848_s24, %s6217_s19 }
  0x20   : > { %p5851_p8 = pnand %p6234_p7, %p5849_p6  ;;  %p5856_p12 = por %p5855_p11, %p5854_p10 }
  0x22   : > { %p5852_p9 = pneg %p5851_p8  ;;  %p5858_p1 = por %p5857_p13, %p5856_p12 }
  0x24   : > { %p5859_p2 = pnand %p5858_p1, %p5852_p9 }
  0x26   : > { %5862 = shalt.err (!%p5859_p2)
}
  0x27   : > { %s5863_s20 = scalar_lea.vmem %s6224_s21, 256  ;;  %s6104_s26 = smov [#allocation5]  }
  0x28   : > { %p5864_p3 = scmp.ne.s32.totalorder %s6224_s21, %s5863_s20  ;;  %s5868_s10 = sshll.u32 %s6104_s26, 4  ;;  %s5869_s10 = int_to_ptr.vmem [resolvable:$false] %s5868_s10 }
  0x29   : > { %s5870_s17 = scalar_lea.vmem %s5869_s10, 512  ;;  %p5871_p8 = scmp.lt.s32.totalorder %s6224_s21, %s5869_s10 }
  0x2a   : > { %p5866_p4 = pnand %p5864_p3, %p6234_p7  ;;  %p5872_p0 = scmp.lt.s32.totalorder %s5870_s17, %s5863_s20 }
  0x2c   : > { %p5867_p6 = pneg %p5866_p4  ;;  %p5873_p10 = por %p5872_p0, %p5871_p8 }
  0x2e   : > { %p5874_p11 = pnand %p5873_p10, %p5867_p6 }
  0x30   : > { %5877 = shalt.err (!%p5874_p11)
}
  0x31   : > { %s7276_s24 = smov 128   ;;  %s7279_s11 = smov 8  }
  0x32   : > { %5633 = dma.hbm_to_vmem [thread:$0]  (!%p6220_p5), %s6217_s19, 256, %s6224_s21, %s6228_s23, %s7276_s24, %s7276_s24, %s7279_s11  }
  0x33   : > { %s6263_s18 = sshll.u32 %s294_s14, 5  ;;  %s7278_s20 = sshll.u32 %s6102_s30, 9 }
  0x34   : > { %s7303_s3 = sld [smem:[#allocation26_spill]]  ;;  %s338_s16 = scalar_lea.vmem [#allocation8], %s6263_s18 }
  0x35   : > { %s345_s13 = sshll.u32 %s338_s16, 4  ;;  %s7304_s19 = sand.u32 1, %s6102_s30   ;;  %s6274_s13 = int_to_ptr.vmem [resolvable:$true] %s345_s13 }
  0x36   : > { %s6278_s21 = scalar_lea.sflag [#allocation9], %s7304_s19 }
  0x3a   : > { %s6271_s17 = scalar_lea.hbm %s7303_s3, %s7278_s20  ;;  %s5883_s10 = scalar_lea.hbm %s7303_s3, 1536 }
  0x3b   : > { %s5878_s14 = scalar_lea.hbm %s6271_s17, 512  ;;  %p5884_p13 = scmp.lt.u32.totalorder %s6271_s17, %s7303_s3 }
  0x3c   : > { %p5879_p0 = scmp.ne.s32.totalorder %s6271_s17, %s5878_s14  ;;  %p5885_p1 = scmp.lt.u32.totalorder %s5883_s10, %s5878_s14 }
  0x3d   : > { %p5887_p3 = scmp.lt.u32.totalorder %s5878_s14, %s6271_s17 }
  0x3e   : > { %p5881_p9 = pnand %p5879_p0, %p6234_p7  ;;  %p5886_p2 = por %p5885_p1, %p5884_p13 }
  0x40   : > { %p5882_p12 = pneg %p5881_p9  ;;  %p5888_p4 = por %p5887_p3, %p5886_p2 }
  0x42   : > { %p5889_p6 = pnand %p5888_p4, %p5882_p12 }
  0x44   : > { %5892 = shalt.err (!%p5889_p6)
}
  0x45   : > { %s5893_s16 = scalar_lea.vmem %s6274_s13, 512  ;;  %s6107_s24 = smov [#allocation8]  }
  0x46   : > { %p5894_p8 = scmp.ne.s32.totalorder %s6274_s13, %s5893_s16  ;;  %s5898_s19 = sshll.u32 %s6107_s24, 4  ;;  %s5899_s19 = int_to_ptr.vmem [resolvable:$false] %s5898_s19 }
  0x47   : > { %s5900_s11 = scalar_lea.vmem %s5899_s19, 1024  ;;  %p5901_p0 = scmp.lt.s32.totalorder %s6274_s13, %s5899_s19 }
  0x48   : > { %p5896_p10 = pnand %p5894_p8, %p6234_p7  ;;  %p5902_p9 = scmp.lt.s32.totalorder %s5900_s11, %s5893_s16 }
  0x4a   : > { %p5897_p11 = pneg %p5896_p10  ;;  %p5903_p13 = por %p5902_p9, %p5901_p0 }
  0x4c   : > { %p5904_p1 = pnand %p5903_p13, %p5897_p11 }
  0x4e   : > { %5907 = shalt.err (!%p5904_p1)
}
  0x4f   : > { %s7305_s20 = smov 8   ;;  %s7306_s14 = smov 128  }
  0x50   : > { %5639 = dma.hbm_to_vmem [thread:$0]  (!%p6220_p5), %s6271_s17, 512, %s6274_s13, %s6278_s21, %s7306_s14, %s7306_s14, %s7305_s20  }
  0x51   : > { %s7307_s26 = sshll.u32 %s6102_s30, 8  ;;  %s317_s19 = scalar_lea.vmem [#allocation7], %s6209_s15 }
  0x52   : > { %s6310_s24 = scalar_lea.hbm %s7266_s2, %s7307_s26  ;;  %s324_s11 = sshll.u32 %s317_s19, 4  ;;  %s6341_s11 = int_to_ptr.vmem [resolvable:$true] %s324_s11 }
  0x53   : > { %s365_s1 = scalar_lea.vmem [#allocation10], %s6263_s18  ;;  %s6315_s12 = sadd.s32 4294967295, %s6102_s30  }
  0x54   : > { %s372_s3 = sshll.u32 %s365_s1, 4  ;;  %s5025_s9 = sadd.s32 4294967294, %s6102_s30   ;;  %s6356_s3 = int_to_ptr.vmem [resolvable:$true] %s372_s3 }
  0x55   : > { %p73_p12 = scmp.ne.s32.totalorder %s6094_s28, %s6090_s27  ;;  %p7287_p2 = scmp.eq.s32.totalorder %s6315_s12, 0 }
  0x56   : > { %p227_p3 = scmp.eq.s32.totalorder %s6315_s12, 2  ;;  %p233_p4 = scmp.eq.s32.totalorder %s5025_s9, 2 }
  0x57   : > { %p5026_p6 = scmp.ge.s32.totalorder %s6102_s30, 1  ;;  %p6325_p8 = por %p7287_p2, %p73_p12 }
  0x58   : > { %p7309_p10 = scmp.ne.s32.totalorder %s6098_s29, %s6094_s28  ;;  %p6336_p0 = por %p233_p4, %p73_p12 }
  0x59   : > { %s7308_s13 = scalar_select %p6325_p8, 1, 0 }
  0x5a   : > { %p6332_p11 = por %p227_p3, %p7309_p10  ;;  %p266_p9 = scmp.lt.s32.totalorder %s6102_s30, 4 }
  0x5b   : > { %s7311_s15 = scalar_select %p6336_p0, 1, 0 }
  0x5c   : > { %s7310_s1 = scalar_select %p6332_p11, 1, 0 }
  0x5d   : > { %7312 = sst [smem:[#allocation24_spill]] %s7311_s15  ;;  %p6343_p13 = pnand %p5026_p6, %p266_p9 }
  0x5e   : > { %s7314_s18 = sshll.u32 %s6102_s30, 9  ;;  %s6108_s16 = smov [#allocation2]  }
  0x5f   : > { %s7313_s9 = scalar_select %p6343_p13, 1, 0 }
  0x60   : > { %s6352_s10 = scalar_lea.hbm %s7269_s5, %s7314_s18  ;;  %s6354_s19 = sshll.u32 %s6108_s16, 4  ;;  %s6386_s19 = int_to_ptr.vmem [resolvable:$true] %s6354_s19 }
  0x61   : > { %s5908_s29 = scalar_lea.hbm %s6310_s24, 256  ;;  %s5913_s30 = scalar_lea.hbm %s7266_s2, 768 }
  0x62   : > { %p5909_p12 = scmp.ne.s32.totalorder %s6310_s24, %s5908_s29  ;;  %p5914_p6 = scmp.lt.u32.totalorder %s6310_s24, %s7266_s2 }
  0x63   : > { %p5915_p10 = scmp.lt.u32.totalorder %s5913_s30, %s5908_s29  ;;  %p5917_p2 = scmp.lt.u32.totalorder %s5908_s29, %s6310_s24 }
  0x64   : > { %p5911_p3 = pnand %p5909_p12, %p6234_p7 }
  0x65   : > { %p5916_p9 = por %p5915_p10, %p5914_p6 }
  0x66   : > { %p5912_p4 = pneg %p5911_p3 }
  0x67   : > { %p5918_p0 = por %p5917_p2, %p5916_p9 }
  0x69   : > { %p5919_p11 = pnand %p5918_p0, %p5912_p4 }
  0x6b   : > { %5922 = shalt.err (!%p5919_p11)
}
  0x6c   : > { %s5923_s18 = scalar_lea.vmem %s6341_s11, 256  ;;  %s6109_s27 = smov [#allocation7]  }
  0x6d   : > { %p5924_p12 = scmp.ne.s32.totalorder %s6341_s11, %s5923_s18  ;;  %s5928_s15 = sshll.u32 %s6109_s27, 4  ;;  %s5929_s15 = int_to_ptr.vmem [resolvable:$false] %s5928_s15 }
  0x6e   : > { %s5930_s16 = scalar_lea.vmem %s5929_s15, 512  ;;  %p5931_p8 = scmp.lt.s32.totalorder %s6341_s11, %s5929_s15 }
  0x6f   : > { %p5926_p3 = pnand %p5924_p12, %p6234_p7  ;;  %p5932_p13 = scmp.lt.s32.totalorder %s5930_s16, %s5923_s18 }
  0x71   : > { %p5927_p1 = pneg %p5926_p3  ;;  %p5933_p6 = por %p5932_p13, %p5931_p8 }
  0x73   : > { %p5934_p10 = pnand %p5933_p6, %p5927_p1 }
  0x75   : > { %5937 = shalt.err (!%p5934_p10)
}
  0x76   : > { %5636 = dma.hbm_to_vmem [thread:$0]  (!%p6220_p5), %s6310_s24, 256, %s6341_s11, %s6228_s23, %s7306_s14, %s7306_s14, %s7305_s20  }
  0x77   : > { %p7315_p2 = scmp.eq.s32.totalorder %s6315_s12, 0  ;;  %p7316_p8 = scmp.ne.s32.totalorder %s7313_s9, 0 }
  0x78   : > { %s5938_s30 = scalar_lea.hbm %s6352_s10, 512  ;;  %s5943_s18 = scalar_lea.hbm %s7269_s5, 1536 }
  0x79   : > { %p7317_p11 = pneg %p7316_p8  ;;  %p5939_p13 = scmp.ne.s32.totalorder %s6352_s10, %s5938_s30 }
  0x7a   : > { %p5944_p9 = scmp.lt.u32.totalorder %s6352_s10, %s7269_s5  ;;  %p5945_p12 = scmp.lt.u32.totalorder %s5943_s18, %s5938_s30 }
  0x7b   : > { %p6393_p0 = pnand %p7317_p11, %p7315_p2  ;;  %p5941_p1 = pnand %p5939_p13, %p6234_p7 }
  0x7c   : > { %p5946_p3 = por %p5945_p12, %p5944_p9  ;;  %p5947_p6 = scmp.lt.u32.totalorder %s5938_s30, %s6352_s10 }
  0x7d   : > { %s7318_s29 = scalar_select %p6393_p0, 1, 0 }
  0x7e   : > { %p5942_p4 = pneg %p5941_p1  ;;  %p5948_p10 = por %p5947_p6, %p5946_p3 }
  0x80   : > { %p5949_p2 = pnand %p5948_p10, %p5942_p4 }
  0x82   : > { %5952 = shalt.err (!%p5949_p2)
}
  0x83   : > { %s5953_s24 = scalar_lea.vmem %s6356_s3, 512  ;;  %s6110_s11 = smov [#allocation10]  }
  0x84   : > { %p5954_p11 = scmp.ne.s32.totalorder %s6356_s3, %s5953_s24  ;;  %s5958_s15 = sshll.u32 %s6110_s11, 4  ;;  %s5959_s15 = int_to_ptr.vmem [resolvable:$false] %s5958_s15 }
  0x85   : > { %s5960_s16 = scalar_lea.vmem %s5959_s15, 1024  ;;  %p5961_p8 = scmp.lt.s32.totalorder %s6356_s3, %s5959_s15 }
  0x86   : > { %p5956_p13 = pnand %p5954_p11, %p6234_p7  ;;  %p5962_p0 = scmp.lt.s32.totalorder %s5960_s16, %s5953_s24 }
  0x88   : > { %p5957_p1 = pneg %p5956_p13  ;;  %p5963_p9 = por %p5962_p0, %p5961_p8 }
  0x8a   : > { %p5964_p12 = pnand %p5963_p9, %p5957_p1 }
  0x8c   : > { %5967 = shalt.err (!%p5964_p12)
}
  0x8d   : > { %5642 = dma.hbm_to_vmem [thread:$0]  (!%p6220_p5), %s6352_s10, 512, %s6356_s3, %s6278_s21, %s7306_s14, %s7306_s14, %s7305_s20  }
  0x8e   : > { %s5968_s17 = scalar_lea.hbm %s7264_s0, 768  ;;  %p7319_p8 = scmp.ne.s32.totalorder %s7318_s29, 0 }
  0x8f   : > { %p5969_p7 = scmp.ne.s32.totalorder %s7264_s0, %s5968_s17  ;;  %p5975_p6 = scmp.lt.u32.totalorder %s5968_s17, %s7264_s0 }
  0x90   : > { %p5970_p0 = pneg %p7319_p8 }
  0x92   : > { %p5971_p4 = pnand %p5970_p0, %p5969_p7 }
  0x94   : > { %p5972_p3 = pneg %p5971_p4 }
  0x96   : > { %p5977_p10 = pnand %p5975_p6, %p5972_p3 }
  0x98   : > { %5980 = shalt.err (!%p5977_p10)
}
  0x99   : > { %s5981_s3 = scalar_lea.vmem %s6386_s19, 768  ;;  %p5989_p13 = scmp.lt.s32.totalorder %s6386_s19, %s6386_s19 }
  0x9a   : > { %p5982_p5 = scmp.ne.s32.totalorder %s6386_s19, %s5981_s3  ;;  %p5990_p1 = scmp.lt.s32.totalorder %s5981_s3, %s5981_s3 }
  0x9c   : > { %p5984_p2 = pnand %p5982_p5, %p5970_p0  ;;  %p5991_p9 = por %p5990_p1, %p5989_p13 }
  0x9e   : > { %p5985_p11 = pneg %p5984_p2 }
  0xa0   : > { %p5992_p12 = pnand %p5991_p9, %p5985_p11 }
  0xa2   : > { %5995 = shalt.err (!%p5992_p12)
}
  0xa3   : > { %5629 = dma.hbm_to_vmem [thread:$0]  (!%p7319_p8), %s7264_s0, 768, %s6386_s19, [#allocation3], %s7306_s14, %s7306_s14, %s7305_s20  }
  0xa4   : > { %p7320_p7 = scmp.ne.s32.totalorder %s7313_s9, 0 }
  0xa5   : > { %p7321_p0 = scmp.eq.s32.totalorder (!%p7320_p7), %s6315_s12, 0 }
  0xa6   : > { %390 = sbr.rel (%p7320_p7) target bundleno = 4009 (0xfa9), region = 48 }
  0xad   : > { %6069 = dma.done.wait (%p7321_p0), [#allocation3], 768   ;;  %p7322_p4 = pmov %p7321_p0 }
  0xae   : > { %s396_s29 = sand.u32 1, %s6315_s12   ;;  %s6454_s23 = sand.u32 1, %s6094_s28  }
  0xaf   : > { %6071 = vsyncadd (%p7322_p4), [#allocation3], 4294966528  ;;  %s6457_s24 = sshll.u32 %s6454_s23, 4  ;;  %s397_s20 = scalar_lea.sflag [#allocation6], %s396_s29 }
  0xb0   : > { %s400_s14 = scalar_lea.vmem [#allocation5], %s6457_s24  ;;  %p7323_p8 = scmp.ne.s32.totalorder %s7308_s13, 0 }
  0xb2   : > { %6073 = dma.done.wait (%p7323_p8), %s397_s20, 512  }
  0xb3   : > { %6075 = vsyncadd (%p7323_p8), %s397_s20, 4294966784  ;;  %s5045_s9 = sshll.u32 %s6454_s23, 5  ;;  %s409_s19 = scalar_lea.vmem [#allocation7], %s6457_s24 }
  0xb4   : > { %s415_s11 = scalar_lea.sflag [#allocation9], %s396_s29  ;;  %s418_s15 = scalar_lea.vmem [#allocation8], %s5045_s9 }
  0xb5   : > { %6077 = dma.done.wait (%p7323_p8), %s415_s11, 1024  }
  0xb6   : > { %6079 = vsyncadd (%p7323_p8), %s415_s11, 4294966272  ;;  %vm512_vm0 = vcmask 261120   ;;  %v494_v0 = vld [vmem:[%s418_s15] sm:$0xff]  ;;  %v495_v1 = vld [vmem:[%s418_s15 + $0x8] sm:$0xff]  ;;  %p487_p3 = scmp.lt.s32.totalorder %s6315_s12, 2  ;;  %s6111_s13 = smov 96  }
  0xb7   : > { %v496_v2 = vld [vmem:[%s418_s15 + $0x10] sm:$0xff]  ;;  %v5700_v3 = vpack.i.bf16 %v495_v1, %v494_v0  ;;  %v6472_v4 = vpack.c.bf16 %v495_v1, %v494_v0  ;;  %v497_v5 = vld [vmem:[%s418_s15 + $0x18] sm:$0xff]  ;;  %v6112_v19 = vmov 0.0   ;;  %vm6113_vm1 = vmmov 0   ;;  %s6114_s26 = smov 64   ;;  %s6115_s18 = smov 120  }
  0xb8   : > { %v504_v6 = vld [vmem:[%s400_s14] sm:$0xff]  ;;  %v6476_v7 = vpack.c.bf16 %v497_v5, %v496_v2  ;;  %v5705_v8 = vpack.i.bf16 %v497_v5, %v496_v2  ;;  %s6484_s16 = scalar_select %p487_p3, %s6315_s12, 2  ;;  %v505_v10 = vld [vmem:[%s400_s14 + $0x8] sm:$0xff]  ;;  %vm778_vm2 = vcmask 64512   ;;  %vm3087_vm3 = vcmask 58368  }
  0xb9   : > { %5300 = vmatprep.mubr.msk.f32.mxu1 %vm512_vm0, %v504_v6  ;;  %5289 = vmatprep.mubr.msk.f32.mxu0 %vm512_vm0, %v504_v6  ;;  %s6116_s22 = smov 112   ;;  %s6117_s27 = smov 104  }
  0xba   : > { %5701 = vrot.lane.b32.xlu0 %v5700_v3, %s6111_s13  ;;  %5563 = vmatprep.subr.bf16.mxu0 %v6472_v4  ;;  %s489_s17 = scalar_lea.vmem %s7268_s4, %s6484_s16  ;;  %s6631_s3 = scalar_lea.vmem [#allocation10], %s5045_s9 }
  0xbb   : > { %5565 = vmatpush3.bf16.msra.mxu0 %v6472_v4  ;;  %v6491_v9 = vld [vmem:[%s489_s17] ss:$0 sm:$0xff]  ;;  %s492_s29 = scalar_lea.vmem %s7270_s6, %s6484_s16  ;;  %s6756_s20 = scalar_lea.vmem [#allocation11], %s6457_s24 }
  0xbc   : > { %5567 = vmatprep.subr.bf16.mxu0 %v6476_v7  ;;  %610 = vrot.lane.b32.xlu1 %v6491_v9, %s6111_s13  ;;  %s4811_s24 = sshll.u32 %s6756_s20, 4  ;;  %s5154_s14 = sshll.u32 %s6315_s12, 8  ;;  %s7141_s24 = int_to_ptr.vmem [resolvable:$true] %s4811_s24 }
  0xbd   : > { %s7147_s11 = scalar_lea.hbm %s7271_s7, %s5154_s14  ;;  %s4793_s15 = scalar_lea.sflag [#allocation4], %s6454_s23 }
  0xbe   : > { %5706 = vrot.lane.b32.xlu0 %v5705_v8, %s6111_s13  ;;  %s5996_s13 = scalar_lea.vmem %s7141_s24, 256  ;;  %p7324_p10 = scmp.ne.s32.totalorder %s7310_s1, 0 }
  0xbf   : > { %5569 = vmatpush3.bf16.msra.mxu0 %v6476_v7  ;;  %p5997_p6 = scmp.ne.s32.totalorder %s7141_s24, %s5996_s13  ;;  %s6118_s16 = smov [#allocation11]  }
  0xc0   : > { %5711 = vrot.lane.b32.xlu1 %v5700_v3, %s6114_s26  ;;  %s6000_s25 = sshll.u32 %s6118_s16, 4  ;;  %s6001_s25 = int_to_ptr.vmem [resolvable:$false] %s6000_s25 }
  0xc1   : > { %p5998_p5 = pnand %p5997_p6, %p7324_p10  ;;  %s6002_s30 = scalar_lea.vmem %s6001_s25, 512 }
  0xc2   : > { %5290 = vmatmul.mubr.msk.f32.vlgmr.msra.gmra.mrb[0].mxu0 %vm512_vm0, %v505_v10  ;;  %5716 = vrot.lane.b32.xlu0 %v5705_v8, %s6114_s26  ;;  %p6003_p11 = scmp.lt.s32.totalorder %s7141_s24, %s6001_s25  ;;  %p6004_p13 = scmp.lt.s32.totalorder %s6002_s30, %s5996_s13 }
  0xc3   : > { %5311 = vmatprep.mubr.msk.f32.mxu0 %vm512_vm0, %v504_v6  ;;  %p5999_p2 = pneg %p5998_p5 }
  0xc4   : > { %p6005_p1 = por %p6004_p13, %p6003_p11 }
  0xc6   : > { %p6006_p9 = pnand %p6005_p1, %p5999_p2 }
 0x12c   : > { %v5702_v11 = vpop.permute.xlu0 %5701 }
 0x12d   : > { %v5704_v12 = vunpack.i.h.bf16 %v5702_v11  ;;  %v5703_v13 = vunpack.i.l.bf16 %v5702_v11 }
 0x12e   : > { %v6513_v22 = vpop.permute.xlu1 %610 }
 0x12f   : > { %v6499_v14 = vpack.c.bf16 %v5704_v12, %v5703_v13 }
 0x130   : > { %v5707_v15 = vpop.permute.xlu0 %5706 }
 0x131   : > { %v5709_v16 = vunpack.i.h.bf16 %v5707_v15  ;;  %v5708_v17 = vunpack.i.l.bf16 %v5707_v15  ;;  %5571 = vmatprep.subr.bf16.mxu1 %v6499_v14 }
 0x132   : > { %5573 = vmatpush3.bf16.msra.mxu1 %v6499_v14  ;;  %v5712_v29 = vpop.permute.xlu1 %5711 }
 0x133   : > { %v6503_v18 = vpack.c.bf16 %v5709_v16, %v5708_v17  ;;  %v5714_v31 = vunpack.i.h.bf16 %v5712_v29  ;;  %v5713_v32 = vunpack.i.l.bf16 %v5712_v29 }
 0x134   : > { %v5717_v30 = vpop.permute.xlu0 %5716 }
 0x135   : > { %5575 = vmatprep.subr.bf16.mxu1 %v6503_v18  ;;  %v5719_v33 = vunpack.i.h.bf16 %v5717_v30  ;;  %v5718_v34 = vunpack.i.l.bf16 %v5717_v30  ;;  %v5578_v35 = vpack.c.bf16 %v5714_v31, %v5713_v32 }
 0x136   : > { %5577 = vmatpush3.bf16.msra.mxu1 %v6503_v18 }
 0x137   : > { %5314 = vmatprep.subr.mxu1 %v6112_v19  ;;  %v5582_v36 = vpack.c.bf16 %v5719_v33, %v5718_v34  ;;  %5579 = vmatprep.subr.bf16.mxu0 %v5578_v35 }
 0x138   : > { %5581 = vmatpush3.bf16.msra.mxu0 %v5578_v35 }
 0x139   : > { %5301 = vmatmul.mubr.msk.f32.vlgmr.msra.gmra.mrb[0].mxu1 %vm512_vm0, %v505_v10  ;;  %5583 = vmatprep.subr.bf16.mxu0 %v5582_v36 }
 0x13a   : > { %5316 = vmatprep.mubr.msk.f32.mxu1 %vm6113_vm1, %v6112_v19 }
 0x13c   : > { %5585 = vmatpush3.bf16.msra.mxu0 %v5582_v36 }
 0x13d   : > { %5324 = vmatprep.subr.mxu0 %v6112_v19 }
 0x13f   : > { %5312 = vmatmul.mubr.msk.f32.vlgmr.msra.gmra.mrb[2].mxu0 %vm512_vm0, %v505_v10 }
 0x140   : > { %5326 = vmatprep.mubr.msk.f32.mxu0 %vm6113_vm1, %v6112_v19 }
 0x195   : > { %v5291_v20 = vpop.f32.mrb[0].mxu0 }
 0x196   : > { %v585_v21 = vpop.f32.mrb[1].mxu0  ;;  %v6534_v28 = vadd.f32 %v5291_v20, %v6491_v9 }
 0x197   : > { %v6519_v26 = vadd.f32 %v6491_v9, %v585_v21 }
 0x20c   : > { %v5302_v23 = vpop.f32.mrb[0].mxu1 }
 0x20d   : > { %v679_v24 = vpop.f32.mrb[1].mxu1  ;;  %v6525_v27 = vadd.f32 %v5302_v23, %v6513_v22 }
 0x20e   : > { %v6516_v25 = vadd.f32 %v679_v24, %v6513_v22 }
 0x210   : > { %5315 = vmatpush3.xpose.msk.msra.mxu1 %vm778_vm2, %v6516_v25 }
 0x211   : > { %5319 = vmatprep.subr.mxu1 %v6112_v19 }
 0x212   : > { %v5313_v47 = vpop.f32.mrb[2].mxu0 }
 0x213   : > { %5317 = vmatmul.mubr.msk.f32.vlgmr.msra.gmra.mrb[2].mxu1 %vm778_vm2, %v6519_v26  ;;  %v769_v48 = vpop.f32.mrb[3].mxu0 }
 0x214   : > { %5320 = vmatpush3.xpose.msk.msra.mxu1 %vm778_vm2, %v6525_v27  ;;  %5321 = vmatprep.mubr.msk.f32.mxu1 %vm6113_vm1, %v6112_v19 }
 0x215   : > { %5329 = vmatprep.subr.mxu1 %v6112_v19 }
 0x217   : > { %5322 = vmatmul.mubr.msk.f32.vlgmr.msra.gmra.mrb[4].mxu1 %vm778_vm2, %v6534_v28 }
 0x218   : > { %5331 = vmatprep.mubr.msk.f32.mxu1 %vm6113_vm1, %v6112_v19 }
 0x2e6   : > { %v851_v37 = vpop.f32.mrb[2].mxu1 }
 0x2e7   : > { %v5318_v38 = vpop.f32.mrb[3].mxu1  ;;  %v931_v49 = vsel %vm778_vm2, %v851_v37, -inf }
 0x2ea   : > { %v927_v39 = vpop.f32.mrb[4].mxu1 }
 0x2eb   : > { %v5323_v40 = vpop.f32.mrb[5].mxu1  ;;  %v934_v41 = vsel %vm778_vm2, %v927_v39, -inf }
 0x2ec   : > { %935 = vmax.xlane.f32.xlu1 %v934_v41 }
 0x2fd   : > { %1179 = vrot.lane.b32.xlu1 %v6525_v27, %s6115_s18 }
 0x301   : > { %1177 = vrot.lane.b32.xlu1 %v6534_v28, %s6115_s18 }
 0x379   : > { %v936_v42 = vpop.xlane.xlu1 %935 }
 0x37a   : > { %v938_v43 = vsub.f32 %v927_v39, %v936_v42 }
 0x37c   : > { %v941_v44 = vmul.f32 1.442695, %v938_v43 }
 0x37d   : > { %v1180_v55 = vpop.permute.xlu1 %1179 }
 0x37e   : > { %5720 = vpow2.f32 %v941_v44 }
 0x381   : > { %v1178_v57 = vpop.permute.xlu1 %1177 }
 0x388   : > { %v5721_v45 = vpop.eup %5720 }
 0x389   : > { %v946_v46 = vsel %vm778_vm2, %v5721_v45, 0.0 }
 0x38a   : > { %947 = vadd.xlane.f32.xlu0 %v946_v46 }
 0x3a0   : > { %700 = vrot.lane.b32.xlu0 %v6491_v9, %s6114_s26 }
 0x3bf   : > { %932 = vmax.xlane.f32.xlu0 %v931_v49 }
 0x3d5   : > { %1101 = vrot.lane.b32.xlu0 %v6516_v25, %s6115_s18 }
 0x417   : > { %v948_v50 = vpop.xlane.xlu0 %947 }
 0x418   : > { %5722 = vrcp.f32 %v948_v50 }
 0x41b   : > { %v701_v51 = vpop.permute.xlu0 %700 }
 0x41c   : > { %v6556_v52 = vadd.f32 %v5313_v47, %v701_v51  ;;  %v6558_v53 = vadd.f32 %v769_v48, %v701_v51 }
 0x41e   : > { %5330 = vmatpush3.msra.mxu1 %v6556_v52  ;;  %5325 = vmatpush3.msra.mxu0 %v6558_v53 }
 0x41f   : > { %5339 = vmatprep.subr.mxu1 %v6112_v19  ;;  %5334 = vmatprep.subr.mxu0 %v6112_v19 }
 0x422   : > { %v5723_v54 = vpop.eup %5722 }
 0x423   : > { %v952_v56 = vmul.f32 %v5723_v54, %v5721_v45 }
 0x425   : > { %5332 = vmatmul.mubr.msk.f32.vlgmr.msra.gmra.mrb[6].mxu1 %vm778_vm2, %v952_v56  ;;  %v499_v56 = vld [vmem:[%s6631_s3] sm:$0xff] }
 0x426   : > { %5340 = vmatpush3.xpose.msk.msra.mxu1 %vm778_vm2, %v1180_v55  ;;  %5341 = vmatprep.mubr.msk.f32.mxu1 %vm6113_vm1, %v6112_v19  ;;  %v500_v55 = vld [vmem:[%s6631_s3 + $0x8] sm:$0xff] }
 0x427   : > { %5349 = vmatprep.subr.mxu1 %v6112_v19 }
 0x429   : > { %5342 = vmatmul.mubr.msk.f32.vlgmr.msra.gmra.mrb[8].mxu1 %vm778_vm2, %v1178_v57 }
 0x42a   : > { %5351 = vmatprep.mubr.msk.f32.mxu1 %vm6113_vm1, %v6112_v19 }
 0x44c   : > { %v933_v58 = vpop.xlane.xlu0 %932 }
 0x44d   : > { %v937_v59 = vsub.f32 %v851_v37, %v933_v58 }
 0x44f   : > { %v939_v60 = vmul.f32 1.442695, %v937_v59 }
 0x450   : > { %v1102_v2 = vpop.permute.xlu0 %1101 }
 0x451   : > { %5724 = vpow2.f32 %v939_v60 }
 0x45b   : > { %v5725_v61 = vpop.eup %5724 }
 0x45c   : > { %v943_v62 = vsel %vm778_vm2, %v5725_v61, 0.0 }
 0x45d   : > { %944 = vadd.xlane.f32.xlu1 %v943_v62 }
 0x46e   : > { %1099 = vrot.lane.b32.xlu1 %v6519_v26, %s6115_s18 }
 0x472   : > { %1595 = vrot.lane.b32.xlu1 %v6516_v25, %s6116_s22 }
 0x4ea   : > { %v945_v63 = vpop.xlane.xlu1 %944 }
 0x4eb   : > { %5726 = vrcp.f32 %v945_v63 }
 0x4ee   : > { %v1100_v6 = vpop.permute.xlu1 %1099 }
 0x4f2   : > { %v1596_v31 = vpop.permute.xlu1 %1595 }
 0x4f5   : > { %v5727_v0 = vpop.eup %5726 }
 0x4f6   : > { %v951_v1 = vmul.f32 %v5727_v0, %v5725_v61 }
 0x4f8   : > { %5327 = vmatmul.mubr.msk.f32.vlgmr.msra.gmra.mrb[4].mxu0 %vm778_vm2, %v951_v1  ;;  %v6578_v3 = vpop.f32.mrb[6].mxu1 }
 0x4f9   : > { %5335 = vmatpush3.xpose.msk.msra.mxu0 %vm778_vm2, %v1102_v2  ;;  %v5333_v5 = vpop.f32.mrb[7].mxu1  ;;  %5336 = vmatprep.mubr.msk.f32.mxu0 %vm6113_vm1, %v6112_v19 }
 0x4fa   : > { %5344 = vmatprep.subr.mxu0 %v6112_v19 }
 0x4fc   : > { %5337 = vmatmul.mubr.msk.f32.vlgmr.msra.gmra.mrb[6].mxu0 %vm778_vm2, %v1100_v6  ;;  %v1251_v8 = vpop.f32.mrb[8].mxu1 }
 0x4fd   : > { %v5343_v10 = vpop.f32.mrb[9].mxu1  ;;  %v1258_v11 = vsel %vm778_vm2, %v1251_v8, -inf  ;;  %5346 = vmatprep.mubr.msk.f32.mxu0 %vm6113_vm1, %v6112_v19 }
 0x4fe   : > { %1259 = vmax.xlane.f32.xlu0 %v1258_v11  ;;  %v501_v10 = vld [vmem:[%s6631_s3 + $0x10] sm:$0xff] }
 0x514   : > { %1355 = vrot.lane.b32.xlu0 %v6556_v52, %s6115_s18 }
 0x518   : > { %1593 = vrot.lane.b32.xlu0 %v6519_v26, %s6116_s22 }
 0x51c   : > { %1671 = vrot.lane.b32.xlu0 %v6534_v28, %s6116_s22 }
 0x58b   : > { %v1260_v12 = vpop.xlane.xlu0 %1259 }
 0x58c   : > { %v1262_v13 = vsub.f32 %v1251_v8, %v1260_v12 }
 0x58e   : > { %v1265_v15 = vmul.f32 1.442695, %v1262_v13 }
 0x58f   : > { %v1356_v16 = vpop.permute.xlu0 %1355 }
 0x590   : > { %5728 = vpow2.f32 %v1265_v15  ;;  %5350 = vmatpush3.msra.mxu1 %v1356_v16 }
 0x591   : > { %5364 = vmatprep.subr.mxu1 %v6112_v19 }
 0x593   : > { %v1594_v35 = vpop.permute.xlu0 %1593 }
 0x597   : > { %v1672_v37 = vpop.permute.xlu0 %1671 }
 0x59a   : > { %v5729_v17 = vpop.eup %5728 }
 0x59b   : > { %v1270_v20 = vsel %vm778_vm2, %v5729_v17, 0.0 }
 0x59c   : > { %1271 = vadd.xlane.f32.xlu1 %v1270_v20 }
 0x5ad   : > { %1673 = vrot.lane.b32.xlu1 %v6525_v27, %s6116_s22 }
 0x5cb   : > { %v6598_v21 = vpop.f32.mrb[4].mxu0 }
 0x5cc   : > { %v5328_v23 = vpop.f32.mrb[5].mxu0 }
 0x5cf   : > { %v1173_v24 = vpop.f32.mrb[6].mxu0 }
 0x5d0   : > { %v5338_v29 = vpop.f32.mrb[7].mxu0  ;;  %v1255_v30 = vsel %vm778_vm2, %v1173_v24, -inf }
 0x5d1   : > { %1256 = vmax.xlane.f32.xlu1 %v1255_v30 }
 0x629   : > { %v1272_v32 = vpop.xlane.xlu1 %1271 }
 0x62a   : > { %5730 = vrcp.f32 %v1272_v32 }
 0x62d   : > { %v1674_v36 = vpop.permute.xlu1 %1673 }
 0x634   : > { %v5731_v33 = vpop.eup %5730 }
 0x635   : > { %v1276_v34 = vmul.f32 %v5731_v33, %v5729_v17 }
 0x637   : > { %5352 = vmatmul.mubr.msk.f32.vlgmr.msra.gmra.mrb[10].mxu1 %vm778_vm2, %v1276_v34 }
 0x638   : > { %5365 = vmatpush3.xpose.msk.msra.mxu1 %vm778_vm2, %v1596_v31  ;;  %5366 = vmatprep.mubr.msk.f32.mxu1 %vm6113_vm1, %v6112_v19 }
 0x639   : > { %5369 = vmatprep.subr.mxu1 %v6112_v19 }
 0x63b   : > { %5367 = vmatmul.mubr.msk.f32.vlgmr.msra.gmra.mrb[12].mxu1 %vm778_vm2, %v1594_v35 }
 0x63c   : > { %5370 = vmatpush3.xpose.msk.msra.mxu1 %vm778_vm2, %v1674_v36  ;;  %5371 = vmatprep.mubr.msk.f32.mxu1 %vm6113_vm1, %v6112_v19 }
 0x63d   : > { %5379 = vmatprep.subr.mxu1 %v6112_v19 }
 0x63f   : > { %5372 = vmatmul.mubr.msk.f32.vlgmr.msra.gmra.mrb[14].mxu1 %vm778_vm2, %v1672_v37 }
 0x640   : > { %5381 = vmatprep.mubr.msk.f32.mxu1 %vm6113_vm1, %v6112_v19 }
 0x65e   : > { %v1257_v38 = vpop.xlane.xlu1 %1256 }
 0x65f   : > { %v1261_v39 = vsub.f32 %v1173_v24, %v1257_v38 }
 0x661   : > { %v1263_v40 = vmul.f32 1.442695, %v1261_v39 }
 0x663   : > { %5732 = vpow2.f32 %v1263_v40 }
 0x66d   : > { %v5733_v41 = vpop.eup %5732 }
 0x66e   : > { %v1267_v42 = vsel %vm778_vm2, %v5733_v41, 0.0 }
 0x66f   : > { %1268 = vadd.xlane.f32.xlu0 %v1267_v42 }
 0x685   : > { %1278 = vrot.lane.b32.xlu0 %v6558_v53, %s6115_s18 }
 0x689   : > { %1847 = vrot.lane.b32.xlu0 %v6556_v52, %s6116_s22 }
 0x68d   : > { %2008 = vrot.lane.b32.xlu0 %v6516_v25, %s6117_s27 }
 0x691   : > { %2086 = vrot.lane.b32.xlu0 %v6525_v27, %s6117_s27 }
 0x695   : > { %2006 = vrot.lane.b32.xlu0 %v6519_v26, %s6117_s27 }
 0x6fc   : > { %v1269_v43 = vpop.xlane.xlu0 %1268 }
 0x6fd   : > { %5734 = vrcp.f32 %v1269_v43 }
 0x700   : > { %v1279_v44 = vpop.permute.xlu0 %1278 }
 0x701   : > { %5345 = vmatpush3.msra.mxu0 %v1279_v44 }
 0x702   : > { %5354 = vmatprep.subr.mxu0 %v500_v55 }
 0x704   : > { %v1848_v45 = vpop.permute.xlu0 %1847 }
 0x705   : > { %5380 = vmatpush3.msra.mxu1 %v1848_v45 }
 0x706   : > { %5389 = vmatprep.subr.mxu1 %v6112_v19 }
 0x707   : > { %v5735_v46 = vpop.eup %5734 }
 0x708   : > { %v1275_v47 = vmul.f32 %v5735_v46, %v5733_v41  ;;  %v2009_v12 = vpop.permute.xlu0 %2008 }
 0x70a   : > { %5347 = vmatmul.mubr.msk.f32.vlgmr.msra.gmra.mrb[8].mxu0 %vm778_vm2, %v1275_v47  ;;  %v1427_v25 = vpop.f32.mrb[10].mxu1 }
 0x70b   : > { %v5353_v48 = vpop.f32.mrb[11].mxu1  ;;  %5355 = vmatpush3.msra.mxu0 %v500_v55 }
 0x70c   : > { %5359 = vmatprep.subr.mxu0 %v499_v56  ;;  %v2087_v17 = vpop.permute.xlu0 %2086 }
 0x70e   : > { %v1667_v49 = vpop.f32.mrb[12].mxu1 }
 0x70f   : > { %v5368_v27 = vpop.f32.mrb[13].mxu1  ;;  %v1749_v50 = vsel %vm778_vm2, %v1667_v49, -inf }
 0x710   : > { %1750 = vmax.xlane.f32.xlu1 %v1749_v50  ;;  %v2007_v20 = vpop.permute.xlu0 %2006  ;;  %v2430_v27 = vld [vmem:[%s409_s19 + $0x8] sm:$0xf] }
 0x712   : > { %v1745_v26 = vpop.f32.mrb[14].mxu1 }
 0x713   : > { %v5373_v51 = vpop.f32.mrb[15].mxu1  ;;  %v1752_v54 = vsel %vm778_vm2, %v1745_v26, -inf }
 0x714   : > { %1753 = vmax.xlane.f32.xlu1 %v1752_v54 }
 0x79d   : > { %v1751_v57 = vpop.xlane.xlu1 %1750 }
 0x79e   : > { %v1755_v58 = vsub.f32 %v1667_v49, %v1751_v57  ;;  %v2429_v49 = vld [vmem:[%s409_s19] sm:$0xff] }
 0x7a0   : > { %v1757_v59 = vmul.f32 1.442695, %v1755_v58 }
 0x7a1   : > { %v1754_v60 = vpop.xlane.xlu1 %1753 }
 0x7a2   : > { %5736 = vpow2.f32 %v1757_v59  ;;  %v1756_v61 = vsub.f32 %v1745_v26, %v1754_v60 }
 0x7a4   : > { %v1759_v62 = vmul.f32 1.442695, %v1756_v61 }
 0x7a6   : > { %5738 = vpow2.f32 %v1759_v62  ;;  %v2512_v62 = vld [vmem:[#allocation2] sm:$0xff] }
 0x7ac   : > { %v5737_v63 = vpop.eup %5736 }
 0x7ad   : > { %v1761_v0 = vsel %vm778_vm2, %v5737_v63, 0.0 }
 0x7ae   : > { %1762 = vadd.xlane.f32.xlu1 %v1761_v0 }
 0x7b0   : > { %v5739_v1 = vpop.eup %5738 }
 0x7b1   : > { %v1764_v2 = vsel %vm778_vm2, %v5739_v1, 0.0 }
 0x7b2   : > { %1765 = vadd.xlane.f32.xlu1 %v1764_v2  ;;  %v2514_v2 = vld [vmem:[#allocation2 + $0x10] sm:$0xff] }
 0x7c3   : > { %1771 = vrot.lane.b32.xlu1 %v6558_v53, %s6116_s22 }
 0x7c7   : > { %2084 = vrot.lane.b32.xlu1 %v6534_v28, %s6117_s27 }
 0x7dd   : > { %v1350_v5 = vpop.f32.mrb[8].mxu0 }
 0x7de   : > { %v5348_v6 = vpop.f32.mrb[9].mxu0  ;;  %5356 = vmatprep.mubr.msk.f32.mxu0 %vm778_vm2, %v1350_v5  ;;  %v2515_v5 = vld [vmem:[#allocation2 + $0x18] sm:$0xff] }
 0x7df   : > { %5357 = vmatmul.mubr.msk.f32.vlgmr.msra.gmra.mrb[10].mxu0 %vm778_vm2, %v1427_v25  ;;  %v2516_v6 = vld [vmem:[#allocation2 + $0x20] sm:$0xff] }
 0x7e0   : > { %5361 = vmatprep.mubr.msk.f32.mxu0 %vm778_vm2, %v6598_v21  ;;  %5360 = vmatpush3.msra.mxu0 %v499_v56 }
 0x7e1   : > { %5374 = vmatprep.subr.mxu0 %v6112_v19 }
 0x7e7   : > { %5362 = vmatmul.mubr.msk.f32.vlgmr.msra.gmra.mrb[10].mxu0 %vm778_vm2, %v6578_v3 }
 0x7e8   : > { %5376 = vmatprep.mubr.msk.f32.mxu0 %vm6113_vm1, %v6112_v19 }
 0x83b   : > { %v1763_v8 = vpop.xlane.xlu1 %1762 }
 0x83c   : > { %5740 = vrcp.f32 %v1763_v8 }
 0x83f   : > { %v1766_v28 = vpop.xlane.xlu1 %1765 }
 0x840   : > { %5742 = vrcp.f32 %v1766_v28 }
 0x843   : > { %v1772_v11 = vpop.permute.xlu1 %1771 }
 0x844   : > { %5375 = vmatpush3.msra.mxu0 %v1772_v11 }
 0x845   : > { %5384 = vmatprep.subr.mxu0 %v501_v10 }
 0x846   : > { %v5741_v13 = vpop.eup %5740 }
 0x847   : > { %v1769_v15 = vmul.f32 %v5741_v13, %v5737_v63  ;;  %v2085_v30 = vpop.permute.xlu1 %2084 }
 0x849   : > { %5377 = vmatmul.mubr.msk.f32.vlgmr.msra.gmra.mrb[12].mxu0 %vm778_vm2, %v1769_v15 }
 0x84a   : > { %v5743_v16 = vpop.eup %5742  ;;  %5385 = vmatpush3.msra.mxu0 %v501_v10 }
 0x84b   : > { %v1770_v3 = vmul.f32 %v5743_v16, %v5739_v1  ;;  %5394 = vmatprep.subr.mxu0 %v6112_v19  ;;  %v2513_v1 = vld [vmem:[#allocation2 + $0x8] sm:$0xff] }
 0x84d   : > { %5382 = vmatmul.mubr.msk.f32.vlgmr.msra.gmra.mrb[16].mxu1 %vm778_vm2, %v1770_v3 }
 0x84e   : > { %5390 = vmatpush3.xpose.msk.msra.mxu1 %vm778_vm2, %v2009_v12  ;;  %5391 = vmatprep.mubr.msk.f32.mxu1 %vm6113_vm1, %v6112_v19 }
 0x84f   : > { %5399 = vmatprep.subr.mxu1 %v6112_v19 }
 0x851   : > { %5392 = vmatmul.mubr.msk.f32.vlgmr.msra.gmra.mrb[18].mxu1 %vm778_vm2, %v2007_v20 }
 0x852   : > { %5401 = vmatprep.mubr.msk.f32.mxu1 %vm6113_vm1, %v6112_v19 }
 0x91c   : > { %v1843_v21 = vpop.f32.mrb[12].mxu0 }
 0x91d   : > { %v5378_v23 = vpop.f32.mrb[13].mxu0  ;;  %5386 = vmatprep.mubr.msk.f32.mxu0 %vm778_vm2, %v1843_v21 }
 0x920   : > { %v1919_v24 = vpop.f32.mrb[16].mxu1 }
 0x921   : > { %v5383_v29 = vpop.f32.mrb[17].mxu1  ;;  %5387 = vmatmul.mubr.msk.f32.vlgmr.msra.gmra.mrb[10].mxu0 %vm778_vm2, %v1919_v24 }
 0x922   : > { %5395 = vmatpush3.xpose.msk.msra.mxu0 %vm778_vm2, %v2087_v17  ;;  %5396 = vmatprep.mubr.msk.f32.mxu0 %vm6113_vm1, %v6112_v19 }
 0x923   : > { %5404 = vmatprep.subr.mxu0 %v6112_v19 }
 0x924   : > { %v2080_v31 = vpop.f32.mrb[18].mxu1 }
 0x925   : > { %v5393_v32 = vpop.f32.mrb[19].mxu1  ;;  %5397 = vmatmul.mubr.msk.f32.vlgmr.msra.gmra.mrb[14].mxu0 %vm778_vm2, %v2085_v30  ;;  %v2162_v33 = vsel %vm778_vm2, %v2080_v31, -inf }
 0x926   : > { %2163 = vmax.xlane.f32.xlu0 %v2162_v33  ;;  %5406 = vmatprep.mubr.msk.f32.mxu0 %vm6113_vm1, %v6112_v19 }
 0x9b3   : > { %v2164_v34 = vpop.xlane.xlu0 %2163 }
 0x9b4   : > { %v2168_v35 = vsub.f32 %v2080_v31, %v2164_v34 }
 0x9b6   : > { %v2170_v36 = vmul.f32 1.442695, %v2168_v35 }
 0x9b8   : > { %5744 = vpow2.f32 %v2170_v36 }
 0x9c2   : > { %v5745_v37 = vpop.eup %5744 }
 0x9c3   : > { %v2174_v38 = vsel %vm778_vm2, %v5745_v37, 0.0 }
 0x9c4   : > { %2175 = vadd.xlane.f32.xlu0 %v2174_v38 }
 0x9f8   : > { %v2158_v39 = vpop.f32.mrb[14].mxu0 }
 0x9f9   : > { %v5398_v40 = vpop.f32.mrb[15].mxu0  ;;  %v2165_v41 = vsel %vm778_vm2, %v2158_v39, -inf }
 0x9fa   : > { %2166 = vmax.xlane.f32.xlu1 %v2165_v41 }
 0xa0b   : > { %2184 = vrot.lane.b32.xlu1 %v6558_v53, %s6117_s27 }
 0xa51   : > { %v2176_v42 = vpop.xlane.xlu0 %2175 }
 0xa52   : > { %5746 = vrcp.f32 %v2176_v42 }
 0xa5c   : > { %v5747_v44 = vpop.eup %5746 }
 0xa5d   : > { %v2182_v47 = vmul.f32 %v5747_v44, %v5745_v37 }
 0xa87   : > { %v2167_v43 = vpop.xlane.xlu1 %2166 }
 0xa88   : > { %v2169_v45 = vsub.f32 %v2158_v39, %v2167_v43 }
 0xa8a   : > { %v2172_v46 = vmul.f32 1.442695, %v2169_v45 }
 0xa8b   : > { %v2185_v25 = vpop.permute.xlu1 %2184 }
 0xa8c   : > { %5748 = vpow2.f32 %v2172_v46  ;;  %5400 = vmatpush3.msra.mxu1 %v2185_v25 }
 0xa8d   : > { %5402 = vmatmul.mubr.msk.f32.vlgmr.msra.gmra.mrb[20].mxu1 %vm778_vm2, %v2182_v47  ;;  %5587 = vmatprep.subr.bf16.mxu1 %v6472_v4 }
 0xa8e   : > { %5589 = vmatpush3.bf16.msra.mxu1 %v6472_v4  ;;  %5422 = vmatprep.mubr.msk.f32.mxu1 %vm512_vm0, %v2429_v49 }
 0xa8f   : > { %5591 = vmatprep.subr.bf16.mxu1 %v6476_v7 }
 0xa92   : > { %5593 = vmatpush3.bf16.msra.mxu1 %v6476_v7  ;;  %v502_v7 = vld [vmem:[%s6631_s3 + $0x18] sm:$0xff] }
 0xa93   : > { %5442 = vmatprep.subr.mxu1 %v6112_v19 }
 0xa95   : > { %5423 = vmatmul.mubr.msk.f32.vlgmr.msra.gmra.mrb[22].mxu1 %vm512_vm0, %v2430_v27 }
 0xa96   : > { %v5749_v53 = vpop.eup %5748  ;;  %5444 = vmatprep.mubr.msk.f32.mxu1 %vm6113_vm1, %v6112_v19 }
 0xa97   : > { %v2177_v48 = vsel %vm778_vm2, %v5749_v53, 0.0 }
 0xa98   : > { %2178 = vadd.xlane.f32.xlu0 %v2177_v48 }
 0xaae   : > { %2260 = vrot.lane.b32.xlu0 %v6556_v52, %s6117_s27 }
 0xb25   : > { %v2179_v4 = vpop.xlane.xlu0 %2178 }
 0xb26   : > { %5750 = vrcp.f32 %v2179_v4 }
 0xb29   : > { %v2261_v50 = vpop.permute.xlu0 %2260 }
 0xb2a   : > { %5405 = vmatpush3.msra.mxu0 %v2261_v50 }
 0xb2b   : > { %5409 = vmatprep.subr.mxu0 %v502_v7 }
 0xb30   : > { %v5751_v26 = vpop.eup %5750 }
 0xb31   : > { %v2183_v51 = vmul.f32 %v5751_v26, %v5749_v53 }
 0xb33   : > { %5407 = vmatmul.mubr.msk.f32.vlgmr.msra.gmra.mrb[16].mxu0 %vm778_vm2, %v2183_v51 }
 0xb34   : > { %5410 = vmatpush3.msra.mxu0 %v502_v7 }
 0xb35   : > { %5595 = vmatprep.subr.bf16.mxu0 %v6499_v14 }
 0xb60   : > { %v2256_v52 = vpop.f32.mrb[20].mxu1 }
 0xb61   : > { %v5403_v54 = vpop.f32.mrb[21].mxu1  ;;  %5411 = vmatprep.mubr.msk.f32.mxu0 %vm778_vm2, %v2256_v52 }
 0xb68   : > { %v5424_v55 = vpop.f32.mrb[22].mxu1 }
 0xb69   : > { %v6697_v56 = vadd.f32 %v5424_v55, %v6491_v9  ;;  %v2503_v57 = vpop.f32.mrb[23].mxu1 }
 0xb6a   : > { %v6707_v59 = vadd.f32 %v6491_v9, %v2503_v57 }
 0xb6b   : > { %3472 = vrot.lane.b32.xlu0 %v6697_v56, %s6115_s18  ;;  %v6702_v58 = vrot.slane %v6697_v56, 2 }
 0xb6c   : > { %v6714_v60 = vrot.slane %v6707_v59, 2  ;;  %v6721_v61 = vrot.slane %v6707_v59, 6  ;;  %v6726_v9 = vrot.slane %v6707_v59, 4 }
 0xb6d   : > { %3550 = vrot.lane.b32.xlu1 %v6702_v58, %s6115_s18 }
 0xb6f   : > { %4012 = vrot.lane.b32.xlu0 %v6697_v56, %s6116_s22 }
 0xb71   : > { %4090 = vrot.lane.b32.xlu1 %v6702_v58, %s6116_s22 }
 0xb73   : > { %3160 = vrot.lane.b32.xlu0 %v6707_v59, %s6115_s18 }
 0xb75   : > { %3238 = vrot.lane.b32.xlu1 %v6714_v60, %s6115_s18 }
 0xb77   : > { %3700 = vrot.lane.b32.xlu0 %v6707_v59, %s6116_s22 }
 0xb79   : > { %3394 = vrot.lane.b32.xlu1 %v6721_v61, %s6115_s18 }
 0xb7b   : > { %3316 = vrot.lane.b32.xlu0 %v6726_v9, %s6115_s18 }
 0xb7d   : > { %3778 = vrot.lane.b32.xlu1 %v6714_v60, %s6116_s22 }
 0xb7f   : > { %3856 = vrot.lane.b32.xlu0 %v6726_v9, %s6116_s22 }
 0xb81   : > { %3934 = vrot.lane.b32.xlu1 %v6721_v61, %s6116_s22 }
 0xbdd   : > { %v3473_v31 = vpop.permute.xlu0 %3472 }
 0xbe1   : > { %v6836_v33 = vpop.permute.xlu0 %4012 }
 0xbe5   : > { %v3161_v35 = vpop.permute.xlu0 %3160 }
 0xbe9   : > { %v3701_v37 = vpop.permute.xlu0 %3700 }
 0xbed   : > { %v3317_v39 = vpop.permute.xlu0 %3316 }
 0xbf1   : > { %v3857_v41 = vpop.permute.xlu0 %3856 }
 0xc06   : > { %v2332_v63 = vpop.f32.mrb[16].mxu0 }
 0xc07   : > { %v5408_v0 = vpop.f32.mrb[17].mxu0  ;;  %5412 = vmatmul.mubr.msk.f32.vlgmr.msra.gmra.mrb[10].mxu0 %vm778_vm2, %v2332_v63 }
 0xc08   : > { %5597 = vmatpush3.bf16.msra.mxu0 %v6499_v14  ;;  %5433 = vmatprep.mubr.msk.f32.mxu0 %vm512_vm0, %v2512_v62  ;;  %v2517_v14 = vld [vmem:[#allocation2 + $0x28] sm:$0xff] }
 0xc09   : > { %5599 = vmatprep.subr.bf16.mxu0 %v6503_v18 }
 0xc0c   : > { %5601 = vmatpush3.bf16.msra.mxu0 %v6503_v18  ;;  %v5087_v18 = vld [vmem:[%s492_s29] ss:$0 sm:$0xff] }
 0xc0d   : > { %5462 = vmatprep.subr.mxu0 %v6112_v19 }
 0xc0f   : > { %5434 = vmatmul.mubr.msk.f32.vlgmr.msra.gmra.mrb[18].mxu0 %vm512_vm0, %v2513_v1 }
 0xc10   : > { %5436 = vmatprep.mubr.msk.f32.mxu0 %vm512_vm0, %v2514_v2 }
 0xc13   : > { %5437 = vmatmul.mubr.msk.f32.gmra.mrb[20].mxu0 %vm512_vm0, %v2515_v5 }
 0xc14   : > { %5439 = vmatprep.mubr.msk.f32.mxu0 %vm512_vm0, %v2516_v6 }
 0xc17   : > { %5440 = vmatmul.mubr.msk.f32.gmra.mrb[22].mxu0 %vm512_vm0, %v2517_v14 }
 0xc18   : > { %5464 = vmatprep.mubr.msk.f32.mxu0 %vm6113_vm1, %v6112_v19 }
 0xcda   : > { %v5413_v8 = vpop.f32.mrb[10].mxu0 }
 0xcdb   : > { %v2426_v28 = vadd.f32 %v5413_v8, %v5087_v18  ;;  %v2408_v10 = vpop.f32.mrb[11].mxu0 }
 0xcdc   : > { %v2425_v11 = vadd.f32 %v5087_v18, %v2408_v10 }
 0xcdd   : > { %2428 = vst.msk [vmem:[%s6756_s20 + $0x8] sm:$0xff] %vm512_vm0, %v2426_v28 }
 0xcde   : > { %2427 = vst.msk [vmem:[%s6756_s20] sm:$0xff] %vm512_vm0, %v2425_v11 }
 0xce2   : > { %v5435_v12 = vpop.f32.mrb[18].mxu0 }
 0xce3   : > { %v2608_v13 = vadd.f32 %v5435_v12, %v6513_v22  ;;  %v2602_v15 = vpop.f32.mrb[19].mxu0 }
 0xce4   : > { %v2603_v16 = vadd.f32 %v2602_v15, %v6513_v22 }
 0xce5   : > { %3240 = vrot.lane.b32.xlu1 %v2608_v13, %s6115_s18 }
 0xce6   : > { %v5438_v17 = vpop.f32.mrb[20].mxu0  ;;  %5443 = vmatpush3.xpose.msk.msra.mxu1 %vm778_vm2, %v2603_v16  ;;  %3702 = vrot.lane.b32.xlu0 %v2603_v16, %s6116_s22 }
 0xce7   : > { %v2612_v3 = vpop.f32.mrb[21].mxu0  ;;  %5447 = vmatprep.subr.mxu1 %v6112_v19  ;;  %v2618_v29 = vadd.f32 %v5438_v17, %v6513_v22 }
 0xce8   : > { %v2613_v20 = vadd.f32 %v2612_v3, %v6513_v22 }
 0xce9   : > { %5445 = vmatmul.mubr.msk.f32.vlgmr.msra.gmra.mrb[24].mxu1 %vm778_vm2, %v6707_v59  ;;  %3780 = vrot.lane.b32.xlu1 %v2608_v13, %s6116_s22 }
 0xcea   : > { %v5441_v21 = vpop.f32.mrb[22].mxu0  ;;  %5448 = vmatpush3.xpose.msk.msra.mxu1 %vm778_vm2, %v2608_v13  ;;  %3318 = vrot.lane.b32.xlu0 %v2613_v20, %s6115_s18 }
 0xceb   : > { %v2622_v23 = vpop.f32.mrb[23].mxu0  ;;  %5449 = vmatprep.mubr.msk.f32.mxu1 %vm6113_vm1, %v6112_v19  ;;  %5452 = vmatprep.subr.mxu1 %v6112_v19  ;;  %v2628_v30 = vadd.f32 %v5441_v21, %v6513_v22 }
 0xcec   : > { %v2623_v24 = vadd.f32 %v2622_v23, %v6513_v22  ;;  %v3551_v22 = vpop.permute.xlu1 %3550 }
 0xced   : > { %3162 = vrot.lane.b32.xlu1 %v2603_v16, %s6115_s18  ;;  %5450 = vmatmul.mubr.msk.f32.vlgmr.msra.gmra.mrb[26].mxu1 %vm778_vm2, %v6714_v60 }
 0xcee   : > { %5463 = vmatpush3.xpose.msk.msra.mxu0 %vm778_vm2, %v2623_v24  ;;  %3858 = vrot.lane.b32.xlu0 %v2613_v20, %s6116_s22 }
 0xcef   : > { %5453 = vmatpush3.xpose.msk.msra.mxu1 %vm778_vm2, %v2613_v20  ;;  %5454 = vmatprep.mubr.msk.f32.mxu1 %vm6113_vm1, %v6112_v19 }
 0xcf0   : > { %5457 = vmatprep.subr.mxu1 %v6112_v19  ;;  %5472 = vmatprep.subr.mxu0 %v6112_v19  ;;  %v6834_v32 = vpop.permute.xlu1 %4090 }
 0xcf1   : > { %5465 = vmatmul.mubr.msk.f32.vlgmr.msra.gmra.mrb[24].mxu0 %vm778_vm2, %v6697_v56  ;;  %3396 = vrot.lane.b32.xlu1 %v2618_v29, %s6115_s18 }
 0xcf2   : > { %5455 = vmatmul.mubr.msk.f32.vlgmr.msra.gmra.mrb[28].mxu1 %vm778_vm2, %v6726_v9  ;;  %3474 = vrot.lane.b32.xlu0 %v2623_v24, %s6115_s18 }
 0xcf3   : > { %5458 = vmatpush3.xpose.msk.msra.mxu1 %vm778_vm2, %v2618_v29  ;;  %5459 = vmatprep.mubr.msk.f32.mxu1 %vm6113_vm1, %v6112_v19 }
 0xcf4   : > { %5467 = vmatprep.subr.mxu1 %v6112_v19  ;;  %5474 = vmatprep.mubr.msk.f32.mxu0 %vm6113_vm1, %v6112_v19  ;;  %v3239_v34 = vpop.permute.xlu1 %3238 }
 0xcf5   : > { %3936 = vrot.lane.b32.xlu1 %v2618_v29, %s6116_s22 }
 0xcf6   : > { %5460 = vmatmul.mubr.msk.f32.vlgmr.msra.gmra.mrb[30].mxu1 %vm778_vm2, %v6721_v61  ;;  %4242 = vrot.lane.b32.xlu0 %v2603_v16, %s6117_s27 }
 0xcf7   : > { %5468 = vmatpush3.xpose.msk.msra.mxu1 %vm778_vm2, %v2628_v30  ;;  %5469 = vmatprep.mubr.msk.f32.mxu1 %vm6113_vm1, %v6112_v19 }
 0xcf8   : > { %5477 = vmatprep.subr.mxu1 %v6112_v19  ;;  %v3395_v36 = vpop.permute.xlu1 %3394 }
 0xcf9   : > { %3552 = vrot.lane.b32.xlu1 %v2628_v30, %s6115_s18 }
 0xcfa   : > { %5470 = vmatmul.mubr.msk.f32.vlgmr.msra.gmra.mrb[32].mxu1 %vm778_vm2, %v6702_v58  ;;  %4240 = vrot.lane.b32.xlu0 %v6707_v59, %s6117_s27 }
 0xcfb   : > { %5479 = vmatprep.mubr.msk.f32.mxu1 %vm6113_vm1, %v6112_v19 }
 0xcfc   : > { %v3779_v38 = vpop.permute.xlu1 %3778 }
 0xcfd   : > { %4092 = vrot.lane.b32.xlu1 %v2628_v30, %s6116_s22 }
 0xcfe   : > { %4014 = vrot.lane.b32.xlu0 %v2623_v24, %s6116_s22 }
 0xd00   : > { %v3935_v40 = vpop.permute.xlu1 %3934 }
 0xd01   : > { %4320 = vrot.lane.b32.xlu1 %v2608_v13, %s6117_s27 }
 0xd02   : > { %4398 = vrot.lane.b32.xlu0 %v2613_v20, %s6117_s27 }
 0xd05   : > { %4318 = vrot.lane.b32.xlu1 %v6714_v60, %s6117_s27 }
 0xd06   : > { %4396 = vrot.lane.b32.xlu0 %v6726_v9, %s6117_s27 }
 0xd09   : > { %4476 = vrot.lane.b32.xlu1 %v2618_v29, %s6117_s27 }
 0xd0a   : > { %4554 = vrot.lane.b32.xlu0 %v2623_v24, %s6117_s27 }
 0xd0d   : > { %4474 = vrot.lane.b32.xlu1 %v6721_v61, %s6117_s27 }
 0xd0e   : > { %4552 = vrot.lane.b32.xlu0 %v6697_v56, %s6117_s27 }
 0xd11   : > { %4632 = vrot.lane.b32.xlu1 %v2628_v30, %s6117_s27 }
 0xd15   : > { %4630 = vrot.lane.b32.xlu1 %v6702_v58, %s6117_s27 }
 0xd57   : > { %v3241_v42 = vpop.permute.xlu1 %3240 }
 0xd58   : > { %v3703_v43 = vpop.permute.xlu0 %3702  ;;  %5478 = vmatpush3.xpose.msk.msra.mxu1 %vm778_vm2, %v3241_v42 }
 0xd59   : > { %5487 = vmatprep.subr.mxu1 %v6112_v19 }
 0xd5b   : > { %v3781_v44 = vpop.permute.xlu1 %3780  ;;  %5480 = vmatmul.mubr.msk.f32.vlgmr.msra.gmra.mrb[34].mxu1 %vm778_vm2, %v3239_v34 }
 0xd5c   : > { %v3319_v45 = vpop.permute.xlu0 %3318  ;;  %5489 = vmatprep.mubr.msk.f32.mxu1 %vm6113_vm1, %v6112_v19 }
 0xd5f   : > { %v3163_v46 = vpop.permute.xlu1 %3162 }
 0xd60   : > { %v3859_v47 = vpop.permute.xlu0 %3858  ;;  %5473 = vmatpush3.xpose.msk.msra.mxu0 %vm778_vm2, %v3163_v46 }
 0xd61   : > { %5482 = vmatprep.subr.mxu0 %v6112_v19 }
 0xd63   : > { %5475 = vmatmul.mubr.msk.f32.vlgmr.msra.gmra.mrb[26].mxu0 %vm778_vm2, %v3161_v35  ;;  %v3397_v25 = vpop.permute.xlu1 %3396 }
 0xd64   : > { %v3475_v53 = vpop.permute.xlu0 %3474  ;;  %5483 = vmatpush3.xpose.msk.msra.mxu0 %vm778_vm2, %v3319_v45  ;;  %5488 = vmatpush3.xpose.msk.msra.mxu1 %vm778_vm2, %v3397_v25 }
 0xd65   : > { %5484 = vmatprep.mubr.msk.f32.mxu0 %vm6113_vm1, %v6112_v19  ;;  %5492 = vmatprep.subr.mxu0 %v6112_v19 }
 0xd66   : > { %5497 = vmatprep.subr.mxu1 %v6112_v19 }
 0xd67   : > { %5485 = vmatmul.mubr.msk.f32.vlgmr.msra.gmra.mrb[28].mxu0 %vm778_vm2, %v3317_v39  ;;  %v3937_v48 = vpop.permute.xlu1 %3936  ;;  %5490 = vmatmul.mubr.msk.f32.vlgmr.msra.gmra.mrb[36].mxu1 %vm778_vm2, %v3395_v36 }
 0xd68   : > { %v4243_v49 = vpop.permute.xlu0 %4242  ;;  %5493 = vmatpush3.xpose.msk.msra.mxu0 %vm778_vm2, %v3475_v53  ;;  %5494 = vmatprep.mubr.msk.f32.mxu0 %vm6113_vm1, %v6112_v19 }
 0xd69   : > { %5502 = vmatprep.subr.mxu0 %v6112_v19  ;;  %5499 = vmatprep.mubr.msk.f32.mxu1 %vm6113_vm1, %v6112_v19 }
 0xd6b   : > { %5495 = vmatmul.mubr.msk.f32.vlgmr.msra.gmra.mrb[30].mxu0 %vm778_vm2, %v3473_v31  ;;  %v3553_v27 = vpop.permute.xlu1 %3552 }
 0xd6c   : > { %v4241_v4 = vpop.permute.xlu0 %4240  ;;  %5498 = vmatpush3.xpose.msk.msra.mxu1 %vm778_vm2, %v3553_v27  ;;  %5503 = vmatpush3.xpose.msk.msra.mxu0 %vm778_vm2, %v3703_v43 }
 0xd6d   : > { %5504 = vmatprep.mubr.msk.f32.mxu0 %vm6113_vm1, %v6112_v19  ;;  %5512 = vmatprep.subr.mxu0 %v6112_v19 }
 0xd6e   : > { %5507 = vmatprep.subr.mxu1 %v6112_v19 }
 0xd6f   : > { %5505 = vmatmul.mubr.msk.f32.vlgmr.msra.gmra.mrb[32].mxu0 %vm778_vm2, %v3701_v37  ;;  %v4093_v7 = vpop.permute.xlu1 %4092  ;;  %5500 = vmatmul.mubr.msk.f32.vlgmr.msra.gmra.mrb[38].mxu1 %vm778_vm2, %v3551_v22 }
 0xd70   : > { %v4015_v50 = vpop.permute.xlu0 %4014  ;;  %5508 = vmatpush3.xpose.msk.msra.mxu1 %vm778_vm2, %v3781_v44  ;;  %5513 = vmatpush3.xpose.msk.msra.mxu0 %vm778_vm2, %v3859_v47 }
 0xd71   : > { %5509 = vmatprep.mubr.msk.f32.mxu1 %vm6113_vm1, %v6112_v19  ;;  %5514 = vmatprep.mubr.msk.f32.mxu0 %vm6113_vm1, %v6112_v19 }
 0xd72   : > { %5522 = vmatprep.subr.mxu0 %v6112_v19  ;;  %5517 = vmatprep.subr.mxu1 %v6112_v19 }
 0xd73   : > { %5515 = vmatmul.mubr.msk.f32.vlgmr.msra.gmra.mrb[34].mxu0 %vm778_vm2, %v3857_v41  ;;  %v4321_v26 = vpop.permute.xlu1 %4320  ;;  %5510 = vmatmul.mubr.msk.f32.vlgmr.msra.gmra.mrb[40].mxu1 %vm778_vm2, %v3779_v38 }
 0xd74   : > { %v4399_v51 = vpop.permute.xlu0 %4398  ;;  %5518 = vmatpush3.xpose.msk.msra.mxu1 %vm778_vm2, %v3937_v48  ;;  %5523 = vmatpush3.xpose.msk.msra.mxu0 %vm778_vm2, %v4015_v50 }
 0xd75   : > { %5519 = vmatprep.mubr.msk.f32.mxu1 %vm6113_vm1, %v6112_v19  ;;  %5524 = vmatprep.mubr.msk.f32.mxu0 %vm6113_vm1, %v6112_v19 }
 0xd76   : > { %5532 = vmatprep.subr.mxu0 %v6112_v19  ;;  %5527 = vmatprep.subr.mxu1 %v6112_v19 }
 0xd77   : > { %5525 = vmatmul.mubr.msk.f32.vlgmr.msra.gmra.mrb[36].mxu0 %vm778_vm2, %v6836_v33  ;;  %v4319_v52 = vpop.permute.xlu1 %4318  ;;  %5520 = vmatmul.mubr.msk.f32.vlgmr.msra.gmra.mrb[42].mxu1 %vm778_vm2, %v3935_v40 }
 0xd78   : > { %v4397_v54 = vpop.permute.xlu0 %4396  ;;  %5528 = vmatpush3.xpose.msk.msra.mxu1 %vm778_vm2, %v4093_v7  ;;  %5533 = vmatpush3.xpose.msk.msra.mxu0 %vm778_vm2, %v4243_v49 }
 0xd79   : > { %5529 = vmatprep.mubr.msk.f32.mxu1 %vm6113_vm1, %v6112_v19  ;;  %5534 = vmatprep.mubr.msk.f32.mxu0 %vm6113_vm1, %v6112_v19 }
 0xd7a   : > { %5542 = vmatprep.subr.mxu0 %v6112_v19  ;;  %5537 = vmatprep.subr.mxu1 %v6112_v19 }
 0xd7b   : > { %5535 = vmatmul.mubr.msk.f32.vlgmr.msra.gmra.mrb[38].mxu0 %vm778_vm2, %v4241_v4  ;;  %v4477_v55 = vpop.permute.xlu1 %4476  ;;  %5530 = vmatmul.mubr.msk.f32.vlgmr.msra.gmra.mrb[44].mxu1 %vm778_vm2, %v6834_v32 }
 0xd7c   : > { %v4555_v56 = vpop.permute.xlu0 %4554  ;;  %5538 = vmatpush3.xpose.msk.msra.mxu1 %vm778_vm2, %v4321_v26  ;;  %5543 = vmatpush3.xpose.msk.msra.mxu0 %vm778_vm2, %v4399_v51 }
 0xd7d   : > { %5539 = vmatprep.mubr.msk.f32.mxu1 %vm6113_vm1, %v6112_v19  ;;  %5544 = vmatprep.mubr.msk.f32.mxu0 %vm6113_vm1, %v6112_v19 }
 0xd7e   : > { %5552 = vmatprep.subr.mxu0 %v6112_v19  ;;  %5547 = vmatprep.subr.mxu1 %v6112_v19 }
 0xd7f   : > { %5545 = vmatmul.mubr.msk.f32.vlgmr.msra.gmra.mrb[40].mxu0 %vm778_vm2, %v4397_v54  ;;  %v4475_v57 = vpop.permute.xlu1 %4474  ;;  %5540 = vmatmul.mubr.msk.f32.vlgmr.msra.gmra.mrb[46].mxu1 %vm778_vm2, %v4319_v52 }
 0xd80   : > { %5548 = vmatpush3.xpose.msk.msra.mxu1 %vm778_vm2, %v4477_v55  ;;  %5553 = vmatpush3.xpose.msk.msra.mxu0 %vm778_vm2, %v4555_v56  ;;  %v4553_v58 = vpop.permute.xlu0 %4552 }
 0xd81   : > { %5549 = vmatprep.mubr.msk.f32.mxu1 %vm6113_vm1, %v6112_v19  ;;  %5554 = vmatprep.mubr.msk.f32.mxu0 %vm6113_vm1, %v6112_v19 }
 0xd82   : > { %5557 = vmatprep.subr.mxu1 %v6112_v19 }
 0xd83   : > { %5555 = vmatmul.mubr.msk.f32.vlgmr.msra.gmra.mrb[42].mxu0 %vm778_vm2, %v4553_v58  ;;  %v4633_v59 = vpop.permute.xlu1 %4632  ;;  %5550 = vmatmul.mubr.msk.f32.vlgmr.msra.gmra.mrb[48].mxu1 %vm778_vm2, %v4475_v57 }
 0xd84   : > { %5558 = vmatpush3.xpose.msk.msra.mxu1 %vm778_vm2, %v4633_v59  ;;  %5559 = vmatprep.mubr.msk.f32.mxu1 %vm6113_vm1, %v6112_v19 }
 0xd87   : > { %v4631_v60 = vpop.permute.xlu1 %4630 }
 0xd88   : > { %5560 = vmatmul.mubr.msk.f32.vlgmr.msra.gmra.mrb[50].mxu1 %vm778_vm2, %v4631_v60 }
 0xdbc   : > { %v6924_v61 = vpop.f32.mrb[24].mxu1 }
 0xdbd   : > { %v5446_v9 = vpop.f32.mrb[25].mxu1  ;;  %v3088_v62 = vsel %vm3087_vm3, %v6924_v61, -inf }
 0xdbe   : > { %3089 = vmax.xlane.f32.xlu0 %v3088_v62 }
 0xdc0   : > { %v6928_v63 = vpop.f32.mrb[26].mxu1 }
 0xdc1   : > { %v5451_v0 = vpop.f32.mrb[27].mxu1  ;;  %v3091_v1 = vsel %vm3087_vm3, %v6928_v63, -inf }
 0xdc2   : > { %3092 = vmax.xlane.f32.xlu1 %v3091_v1 }
 0xdc4   : > { %v6932_v2 = vpop.f32.mrb[24].mxu0 }
 0xdc5   : > { %v6934_v19 = vpop.f32.mrb[28].mxu1  ;;  %v5466_v5 = vpop.f32.mrb[25].mxu0  ;;  %v3100_v6 = vsel %vm3087_vm3, %v6932_v2, -inf }
 0xdc6   : > { %v5456_v14 = vpop.f32.mrb[29].mxu1  ;;  %3101 = vmax.xlane.f32.xlu1 %v3100_v6  ;;  %v3094_v18 = vsel %vm3087_vm3, %v6934_v19, -inf }
 0xdc7   : > { %3095 = vmax.xlane.f32.xlu0 %v3094_v18 }
 0xdc9   : > { %v6940_v8 = vpop.f32.mrb[30].mxu1 }
 0xdca   : > { %v5461_v28 = vpop.f32.mrb[31].mxu1  ;;  %v3097_v10 = vsel %vm3087_vm3, %v6940_v8, -inf }
 0xdcb   : > { %3098 = vmax.xlane.f32.xlu0 %v3097_v10 }
 0xdcd   : > { %v6944_v11 = vpop.f32.mrb[32].mxu1 }
 0xdce   : > { %v5471_v12 = vpop.f32.mrb[33].mxu1  ;;  %v3103_v13 = vsel %vm3087_vm3, %v6944_v11, -inf }
 0xdcf   : > { %3104 = vmax.xlane.f32.xlu0 %v3103_v13 }
 0xe2e   : > { %v6948_v15 = vpop.f32.mrb[34].mxu1 }
 0xe2f   : > { %v5481_v16 = vpop.f32.mrb[35].mxu1  ;;  %v3631_v17 = vsel %vm3087_vm3, %v6948_v15, -inf }
 0xe30   : > { %3632 = vmax.xlane.f32.xlu0 %v3631_v17 }
 0xe36   : > { %v6952_v3 = vpop.f32.mrb[26].mxu0 }
 0xe37   : > { %v5476_v20 = vpop.f32.mrb[27].mxu0  ;;  %v3628_v21 = vsel %vm3087_vm3, %v6952_v3, -inf }
 0xe38   : > { %3629 = vmax.xlane.f32.xlu1 %v3628_v21 }
 0xe3a   : > { %v6956_v23 = vpop.f32.mrb[28].mxu0  ;;  %v6958_v24 = vpop.f32.mrb[36].mxu1 }
 0xe3b   : > { %v5486_v29 = vpop.f32.mrb[29].mxu0  ;;  %v5491_v30 = vpop.f32.mrb[37].mxu1  ;;  %v3634_v22 = vsel %vm3087_vm3, %v6956_v23, -inf  ;;  %v3637_v31 = vsel %vm3087_vm3, %v6958_v24, -inf }
 0xe3c   : > { %3635 = vmax.xlane.f32.xlu1 %v3634_v22  ;;  %3638 = vmax.xlane.f32.xlu0 %v3637_v31 }
 0xe3e   : > { %v6964_v32 = vpop.f32.mrb[30].mxu0 }
 0xe3f   : > { %v5496_v33 = vpop.f32.mrb[31].mxu0  ;;  %v3640_v34 = vsel %vm3087_vm3, %v6964_v32, -inf }
 0xe40   : > { %3641 = vmax.xlane.f32.xlu1 %v3640_v34 }
 0xe42   : > { %v6968_v35 = vpop.f32.mrb[38].mxu1  ;;  %v6970_v36 = vpop.f32.mrb[32].mxu0 }
 0xe43   : > { %v5501_v37 = vpop.f32.mrb[39].mxu1  ;;  %v5506_v38 = vpop.f32.mrb[33].mxu0  ;;  %v4168_v39 = vsel %vm3087_vm3, %v6970_v36, -inf  ;;  %v3643_v40 = vsel %vm3087_vm3, %v6968_v35, -inf }
 0xe44   : > { %4169 = vmax.xlane.f32.xlu1 %v4168_v39  ;;  %3644 = vmax.xlane.f32.xlu0 %v3643_v40 }
 0xe46   : > { %v6976_v41 = vpop.f32.mrb[40].mxu1  ;;  %v6978_v42 = vpop.f32.mrb[34].mxu0 }
 0xe47   : > { %v5511_v43 = vpop.f32.mrb[41].mxu1  ;;  %v5516_v44 = vpop.f32.mrb[35].mxu0  ;;  %v4174_v45 = vsel %vm3087_vm3, %v6978_v42, -inf  ;;  %v4171_v46 = vsel %vm3087_vm3, %v6976_v41, -inf }
 0xe48   : > { %4175 = vmax.xlane.f32.xlu1 %v4174_v45  ;;  %4172 = vmax.xlane.f32.xlu0 %v4171_v46 }
 0xe4a   : > { %v6984_v47 = vpop.f32.mrb[42].mxu1  ;;  %v6986_v25 = vpop.f32.mrb[36].mxu0 }
 0xe4b   : > { %v3090_v53 = vpop.xlane.xlu0 %3089  ;;  %v5521_v48 = vpop.f32.mrb[43].mxu1  ;;  %v4180_v49 = vsel %vm3087_vm3, %v6986_v25, -inf  ;;  %v4177_v27 = vsel %vm3087_vm3, %v6984_v47, -inf }
 0xe4c   : > { %v3106_v4 = vsub.f32 %v6924_v61, %v3090_v53  ;;  %v5526_v7 = vpop.f32.mrb[37].mxu0  ;;  %4181 = vmax.xlane.f32.xlu1 %v4180_v49  ;;  %4178 = vmax.xlane.f32.xlu0 %v4177_v27 }
 0xe4e   : > { %v3112_v50 = vmul.f32 1.442695, %v3106_v4  ;;  %v6993_v26 = vpop.f32.mrb[44].mxu1  ;;  %v6995_v51 = vpop.f32.mrb[38].mxu0 }
 0xe4f   : > { %v5536_v52 = vpop.f32.mrb[39].mxu0  ;;  %v3093_v54 = vpop.xlane.xlu1 %3092  ;;  %v4708_v55 = vsel %vm3087_vm3, %v6995_v51, -inf  ;;  %v4183_v56 = vsel %vm3087_vm3, %v6993_v26, -inf }
 0xe50   : > { %5752 = vpow2.f32 %v3112_v50  ;;  %v3107_v57 = vsub.f32 %v6928_v63, %v3093_v54  ;;  %v5531_v58 = vpop.f32.mrb[45].mxu1  ;;  %4709 = vmax.xlane.f32.xlu1 %v4708_v55  ;;  %4184 = vmax.xlane.f32.xlu0 %v4183_v56 }
 0xe52   : > { %v3114_v59 = vmul.f32 1.442695, %v3107_v57  ;;  %v7002_v60 = vpop.f32.mrb[46].mxu1  ;;  %v7004_v61 = vpop.f32.mrb[40].mxu0 }
 0xe53   : > { %v5546_v9 = vpop.f32.mrb[41].mxu0  ;;  %v3102_v62 = vpop.xlane.xlu1 %3101  ;;  %v4714_v0 = vsel %vm3087_vm3, %v7004_v61, -inf  ;;  %v4711_v1 = vsel %vm3087_vm3, %v7002_v60, -inf }
 0xe54   : > { %5754 = vpow2.f32 %v3114_v59  ;;  %v3110_v5 = vsub.f32 %v6932_v2, %v3102_v62  ;;  %v3096_v63 = vpop.xlane.xlu0 %3095  ;;  %v5541_v6 = vpop.f32.mrb[47].mxu1  ;;  %4715 = vmax.xlane.f32.xlu1 %v4714_v0  ;;  %4712 = vmax.xlane.f32.xlu0 %v4711_v1 }
 0xe55   : > { %v3108_v14 = vsub.f32 %v6934_v19, %v3096_v63 }
 0xe56   : > { %v3120_v18 = vmul.f32 1.442695, %v3110_v5  ;;  %v7012_v28 = vpop.f32.mrb[48].mxu1  ;;  %v7014_v10 = vpop.f32.mrb[42].mxu0 }
 0xe57   : > { %v3116_v12 = vmul.f32 1.442695, %v3108_v14  ;;  %v5556_v13 = vpop.f32.mrb[43].mxu0  ;;  %v5551_v16 = vpop.f32.mrb[49].mxu1  ;;  %v4720_v17 = vsel %vm3087_vm3, %v7014_v10, -inf  ;;  %v4717_v2 = vsel %vm3087_vm3, %v7012_v28, -inf }
 0xe58   : > { %v3099_v20 = vpop.xlane.xlu0 %3098  ;;  %4721 = vmax.xlane.f32.xlu1 %v4720_v17  ;;  %4718 = vmax.xlane.f32.xlu0 %v4717_v2 }
 0xe59   : > { %5756 = vpow2.f32 %v3116_v12  ;;  %v3109_v19 = vsub.f32 %v6940_v8, %v3099_v20 }
 0xe5a   : > { %v7021_v21 = vpop.eup %5752  ;;  %5758 = vpow2.f32 %v3120_v18 }
 0xe5b   : > { %v3118_v29 = vmul.f32 1.442695, %v3109_v19  ;;  %v7023_v30 = vpop.f32.mrb[50].mxu1  ;;  %v3124_v22 = vsel %vm3087_vm3, %v7021_v21, 0.0 }
 0xe5c   : > { %v3105_v31 = vpop.xlane.xlu0 %3104  ;;  %3125 = vadd.xlane.f32.xlu1 %v3124_v22  ;;  %v5561_v33 = vpop.f32.mrb[51].mxu1  ;;  %v4723_v34 = vsel %vm3087_vm3, %v7023_v30, -inf }
 0xe5d   : > { %5760 = vpow2.f32 %v3118_v29  ;;  %v3111_v37 = vsub.f32 %v6944_v11, %v3105_v31  ;;  %4724 = vmax.xlane.f32.xlu0 %v4723_v34 }
 0xe5e   : > { %v7030_v8 = vpop.eup %5754 }
 0xe5f   : > { %v3122_v38 = vmul.f32 1.442695, %v3111_v37  ;;  %v3127_v39 = vsel %vm3087_vm3, %v7030_v8, 0.0 }
 0xe61   : > { %5762 = vpow2.f32 %v3122_v38  ;;  %3128 = vadd.xlane.f32.xlu0 %v3127_v39 }
 0xe63   : > { %v7034_v40 = vpop.eup %5756 }
 0xe64   : > { %v3130_v43 = vsel %vm3087_vm3, %v7034_v40, 0.0  ;;  %v7038_v44 = vpop.eup %5758 }
 0xe65   : > { %3131 = vadd.xlane.f32.xlu1 %v3130_v43  ;;  %v3136_v11 = vsel %vm3087_vm3, %v7038_v44, 0.0 }
 0xe67   : > { %v7040_v45 = vpop.eup %5760 }
 0xe68   : > { %v3133_v46 = vsel %vm3087_vm3, %v7040_v45, 0.0 }
 0xe69   : > { %3137 = vadd.xlane.f32.xlu1 %v3136_v11  ;;  %3134 = vadd.xlane.f32.xlu0 %v3133_v46 }
 0xe6b   : > { %v7046_v53 = vpop.eup %5762 }
 0xe6c   : > { %v3139_v48 = vsel %vm3087_vm3, %v7046_v53, 0.0 }
 0xe6d   : > { %3140 = vadd.xlane.f32.xlu0 %v3139_v48 }
 0xebd   : > { %v3633_v49 = vpop.xlane.xlu0 %3632 }
 0xebe   : > { %v3647_v27 = vsub.f32 %v6948_v15, %v3633_v49 }
 0xec0   : > { %v3654_v4 = vmul.f32 1.442695, %v3647_v27 }
 0xec2   : > { %5764 = vpow2.f32 %v3654_v4 }
 0xec5   : > { %v3630_v7 = vpop.xlane.xlu1 %3629 }
 0xec6   : > { %v3646_v50 = vsub.f32 %v6952_v3, %v3630_v7 }
 0xec8   : > { %v3652_v52 = vmul.f32 1.442695, %v3646_v50 }
 0xec9   : > { %v3636_v54 = vpop.xlane.xlu1 %3635  ;;  %v3639_v55 = vpop.xlane.xlu0 %3638 }
 0xeca   : > { %5766 = vpow2.f32 %v3652_v52  ;;  %v3648_v56 = vsub.f32 %v6956_v23, %v3636_v54  ;;  %v3649_v57 = vsub.f32 %v6958_v24, %v3639_v55 }
 0xecc   : > { %v7054_v58 = vpop.eup %5764  ;;  %v3656_v59 = vmul.f32 1.442695, %v3648_v56  ;;  %v3658_v9 = vmul.f32 1.442695, %v3649_v57 }
 0xecd   : > { %v3642_v62 = vpop.xlane.xlu1 %3641  ;;  %v3667_v15 = vsel %vm3087_vm3, %v7054_v58, 0.0 }
 0xece   : > { %5768 = vpow2.f32 %v3656_v59  ;;  %v3650_v0 = vsub.f32 %v6964_v32, %v3642_v62  ;;  %3668 = vadd.xlane.f32.xlu0 %v3667_v15 }
 0xecf   : > { %5770 = vpow2.f32 %v3658_v9 }
 0xed0   : > { %v3660_v3 = vmul.f32 1.442695, %v3650_v0 }
 0xed1   : > { %v4170_v1 = vpop.xlane.xlu1 %4169  ;;  %v3645_v5 = vpop.xlane.xlu0 %3644 }
 0xed2   : > { %5772 = vpow2.f32 %v3660_v3  ;;  %v4186_v23 = vsub.f32 %v6970_v36, %v4170_v1  ;;  %v3651_v24 = vsub.f32 %v6968_v35, %v3645_v5 }
 0xed4   : > { %v7061_v63 = vpop.eup %5766  ;;  %v4192_v6 = vmul.f32 1.442695, %v4186_v23  ;;  %v3662_v14 = vmul.f32 1.442695, %v3651_v24 }
 0xed5   : > { %v4176_v18 = vpop.xlane.xlu1 %4175  ;;  %v4173_v12 = vpop.xlane.xlu0 %4172  ;;  %v3664_v13 = vsel %vm3087_vm3, %v7061_v63, 0.0 }
 0xed6   : > { %5774 = vpow2.f32 %v4192_v6  ;;  %v4188_v32 = vsub.f32 %v6978_v42, %v4176_v18  ;;  %v4187_v16 = vsub.f32 %v6976_v41, %v4173_v12  ;;  %3665 = vadd.xlane.f32.xlu1 %v3664_v13 }
 0xed7   : > { %5776 = vpow2.f32 %v3662_v14 }
 0xed8   : > { %v7067_v17 = vpop.eup %5768  ;;  %v4196_v36 = vmul.f32 1.442695, %v4188_v32  ;;  %v4194_v35 = vmul.f32 1.442695, %v4187_v16 }
 0xed9   : > { %v7069_v2 = vpop.eup %5770  ;;  %v4182_v20 = vpop.xlane.xlu1 %4181  ;;  %v3670_v29 = vsel %vm3087_vm3, %v7067_v17, 0.0 }
 0xeda   : > { %v4179_v19 = vpop.xlane.xlu0 %4178  ;;  %5778 = vpow2.f32 %v4196_v36  ;;  %v4190_v22 = vsub.f32 %v6986_v25, %v4182_v20  ;;  %3671 = vadd.xlane.f32.xlu1 %v3670_v29  ;;  %v3673_v41 = vsel %vm3087_vm3, %v7069_v2, 0.0 }
 0xedb   : > { %v4189_v42 = vsub.f32 %v6984_v47, %v4179_v19  ;;  %5780 = vpow2.f32 %v4194_v35  ;;  %3674 = vadd.xlane.f32.xlu0 %v3673_v41 }
 0xedc   : > { %v7077_v31 = vpop.eup %5772  ;;  %v4200_v33 = vmul.f32 1.442695, %v4190_v22 }
 0xedd   : > { %v4198_v34 = vmul.f32 1.442695, %v4189_v42  ;;  %v4710_v37 = vpop.xlane.xlu1 %4709  ;;  %v3676_v39 = vsel %vm3087_vm3, %v7077_v31, 0.0 }
 0xede   : > { %v4185_v38 = vpop.xlane.xlu0 %4184  ;;  %5782 = vpow2.f32 %v4200_v33  ;;  %v4726_v25 = vsub.f32 %v6995_v51, %v4710_v37  ;;  %3677 = vadd.xlane.f32.xlu1 %v3676_v39 }
 0xedf   : > { %v4191_v47 = vsub.f32 %v6993_v26, %v4185_v38  ;;  %5784 = vpow2.f32 %v4198_v34 }
 0xee0   : > { %v7083_v43 = vpop.eup %5774  ;;  %v4732_v11 = vmul.f32 1.442695, %v4726_v25 }
 0xee1   : > { %v4202_v46 = vmul.f32 1.442695, %v4191_v47  ;;  %v7085_v48 = vpop.eup %5776  ;;  %v4716_v49 = vpop.xlane.xlu1 %4715  ;;  %v4204_v4 = vsel %vm3087_vm3, %v7083_v43, 0.0 }
 0xee2   : > { %v4713_v27 = vpop.xlane.xlu0 %4712  ;;  %5786 = vpow2.f32 %v4732_v11  ;;  %v4728_v7 = vsub.f32 %v7004_v61, %v4716_v49  ;;  %4205 = vadd.xlane.f32.xlu1 %v4204_v4  ;;  %v3679_v26 = vsel %vm3087_vm3, %v7085_v48, 0.0 }
 0xee3   : > { %v4727_v51 = vsub.f32 %v7002_v60, %v4713_v27  ;;  %5788 = vpow2.f32 %v4202_v46  ;;  %3680 = vadd.xlane.f32.xlu0 %v3679_v26 }
 0xee4   : > { %v7093_v50 = vpop.eup %5778  ;;  %v4736_v52 = vmul.f32 1.442695, %v4728_v7 }
 0xee5   : > { %v4734_v54 = vmul.f32 1.442695, %v4727_v51  ;;  %v7095_v55 = vpop.eup %5780  ;;  %v4722_v56 = vpop.xlane.xlu1 %4721  ;;  %v4210_v59 = vsel %vm3087_vm3, %v7093_v50, 0.0 }
 0xee6   : > { %v4719_v57 = vpop.xlane.xlu0 %4718  ;;  %5790 = vpow2.f32 %v4736_v52  ;;  %v4730_v60 = vsub.f32 %v7014_v10, %v4722_v56  ;;  %4211 = vadd.xlane.f32.xlu1 %v4210_v59  ;;  %v4207_v9 = vsel %vm3087_vm3, %v7095_v55, 0.0 }
 0xee7   : > { %v4729_v61 = vsub.f32 %v7012_v28, %v4719_v57  ;;  %5792 = vpow2.f32 %v4734_v54  ;;  %4208 = vadd.xlane.f32.xlu0 %v4207_v9 }
 0xee8   : > { %v7103_v62 = vpop.eup %5782  ;;  %v4740_v15 = vmul.f32 1.442695, %v4730_v60 }
 0xee9   : > { %v4738_v0 = vmul.f32 1.442695, %v4729_v61  ;;  %v7105_v3 = vpop.eup %5784  ;;  %v4216_v1 = vsel %vm3087_vm3, %v7103_v62, 0.0 }
 0xeea   : > { %5794 = vpow2.f32 %v4740_v15  ;;  %4217 = vadd.xlane.f32.xlu1 %v4216_v1  ;;  %v4213_v28 = vsel %vm3087_vm3, %v7105_v3, 0.0  ;;  %v4725_v10 = vpop.xlane.xlu0 %4724 }
 0xeeb   : > { %5796 = vpow2.f32 %v4738_v0  ;;  %4214 = vadd.xlane.f32.xlu0 %v4213_v28  ;;  %v4731_v5 = vsub.f32 %v7023_v30, %v4725_v10 }
 0xeec   : > { %v7112_v23 = vpop.eup %5786 }
 0xeed   : > { %v7114_v24 = vpop.eup %5788  ;;  %v4742_v6 = vmul.f32 1.442695, %v4731_v5  ;;  %v4744_v14 = vsel %vm3087_vm3, %v7112_v23, 0.0 }
 0xeee   : > { %4745 = vadd.xlane.f32.xlu1 %v4744_v14  ;;  %v4219_v18 = vsel %vm3087_vm3, %v7114_v24, 0.0 }
 0xeef   : > { %5798 = vpow2.f32 %v4742_v6  ;;  %4220 = vadd.xlane.f32.xlu0 %v4219_v18 }
 0xef0   : > { %v7120_v12 = vpop.eup %5790 }
 0xef1   : > { %v7122_v13 = vpop.eup %5792  ;;  %v4750_v30 = vsel %vm3087_vm3, %v7120_v12, 0.0 }
 0xef2   : > { %4751 = vadd.xlane.f32.xlu1 %v4750_v30  ;;  %v4747_v32 = vsel %vm3087_vm3, %v7122_v13, 0.0 }
 0xef3   : > { %4748 = vadd.xlane.f32.xlu0 %v4747_v32 }
 0xef4   : > { %v7128_v16 = vpop.eup %5794 }
 0xef5   : > { %v7130_v36 = vpop.eup %5796  ;;  %v4756_v35 = vsel %vm3087_vm3, %v7128_v16, 0.0 }
 0xef6   : > { %4757 = vadd.xlane.f32.xlu1 %v4756_v35  ;;  %v4753_v20 = vsel %vm3087_vm3, %v7130_v36, 0.0 }
 0xef7   : > { %4754 = vadd.xlane.f32.xlu0 %v4753_v20 }
 0xef9   : > { %v7136_v19 = vpop.eup %5798 }
 0xefa   : > { %v4759_v29 = vsel %vm3087_vm3, %v7136_v19, 0.0 }
 0xefb   : > { %4760 = vadd.xlane.f32.xlu0 %v4759_v29 }
 0xefc   : > { %6009 = shalt.err (!%p6006_p9)
}
 0xefd   : > { %s6010_s17 = scalar_lea.hbm %s7147_s11, 256  ;;  %s6014_s22 = scalar_lea.hbm %s7271_s7, 768 }
 0xefe   : > { %p6011_p12 = scmp.ne.s32.totalorder %s7147_s11, %s6010_s17  ;;  %p6015_p4 = scmp.lt.u32.totalorder %s7147_s11, %s7271_s7 }
 0xeff   : > { %p6016_p8 = scmp.lt.u32.totalorder %s6014_s22, %s6010_s17  ;;  %p6018_p6 = scmp.lt.u32.totalorder %s6010_s17, %s7147_s11 }
 0xf00   : > { %p6012_p7 = pnand %p6011_p12, %p7324_p10 }
 0xf01   : > { %p6017_p3 = por %p6016_p8, %p6015_p4 }
 0xf02   : > { %p6013_p0 = pneg %p6012_p7 }
 0xf03   : > { %p6019_p5 = por %p6018_p6, %p6017_p3 }
 0xf05   : > { %p6020_p2 = pnand %p6019_p5, %p6013_p0 }
 0xf07   : > { %6023 = shalt.err (!%p6020_p2)
}
 0xf08   : > { %s6119_s21 = smov 128   ;;  %s6120_s10 = smov 8   ;;  %v3126_v22 = vpop.xlane.xlu1 %3125  ;;  %v3129_v41 = vpop.xlane.xlu0 %3128 }
 0xf09   : > { %5622 = dma.vmem_to_hbm [thread:$0]  (%p7324_p10), %s7141_s24, 256, %s7147_s11, %s4793_s15, %s6119_s21, %s6119_s21, %s6120_s10   ;;  %5800 = vrcp.f32 %v3126_v22 }
 0xf0a   : > { %5802 = vrcp.f32 %v3129_v41  ;;  %s5608_s29 = smul.u32 12, %s6454_s23  ;;  %s6121_s13 = smov [#allocation12]  }
 0xf0b   : > { %s5609_s24 = smul.u32 192, %s6315_s12  ;;  %s4798_s12 = scalar_lea.sflag [#allocation13], %s6454_s23 }
 0xf0c   : > { %v3132_v42 = vpop.xlane.xlu1 %3131  ;;  %v3135_v33 = vpop.xlane.xlu0 %3134  ;;  %s7194_s20 = scalar_lea.vmem [#allocation12], %s5608_s29  ;;  %s6028_s16 = sshll.u32 %s6121_s13, 4  ;;  %s6029_s16 = int_to_ptr.vmem [resolvable:$false] %s6028_s16 }
 0xf0d   : > { %5804 = vrcp.f32 %v3132_v42  ;;  %s4827_s14 = sshll.u32 %s7194_s20, 4  ;;  %s7219_s11 = scalar_lea.hbm %s7272_s8, %s5609_s24  ;;  %s7214_s14 = int_to_ptr.vmem [resolvable:$true] %s4827_s14 }
 0xf0e   : > { %s6024_s15 = scalar_lea.vmem %s7214_s14, 192  ;;  %s6030_s25 = scalar_lea.vmem %s6029_s16, 384 }
 0xf0f   : > { %p6025_p11 = scmp.ne.s32.totalorder %s7214_s14, %s6024_s15  ;;  %p6031_p9 = scmp.lt.s32.totalorder %s7214_s14, %s6029_s16 }
 0xf10   : > { %v3138_v34 = vpop.xlane.xlu1 %3137  ;;  %v3141_v38 = vpop.xlane.xlu0 %3140  ;;  %p6032_p12 = scmp.lt.s32.totalorder %s6030_s25, %s6024_s15 }
 0xf11   : > { %5806 = vrcp.f32 %v3138_v34  ;;  %p6026_p13 = pnand %p6025_p11, %p7324_p10 }
 0xf12   : > { %5808 = vrcp.f32 %v3135_v33  ;;  %p6033_p7 = por %p6032_p12, %p6031_p9 }
 0xf13   : > { %v5801_v26 = vpop.eup %5800  ;;  %p6027_p1 = pneg %p6026_p13 }
 0xf14   : > { %v5803_v52 = vpop.eup %5802  ;;  %v3148_v14 = vmul.f32 %v5801_v26, %v7021_v21 }
 0xf15   : > { %p6034_p0 = pnand %p6033_p7, %p6027_p1 }
 0xf17   : > { %v5805_v54 = vpop.eup %5804 }
 0xf18   : > { %v3150_v33 = vmul.f32 %v5805_v54, %v7034_v40 }
 0xf1b   : > { %v5807_v57 = vpop.eup %5806 }
 0xf1c   : > { %v5809_v60 = vpop.eup %5808  ;;  %v3152_v40 = vmul.f32 %v5807_v57, %v7038_v44 }
 0xf5b   : > { %v3669_v25 = vpop.xlane.xlu0 %3668 }
 0xf63   : > { %v3666_v37 = vpop.xlane.xlu1 %3665 }
 0xf64   : > { %5810 = vrcp.f32 %v3666_v37 }
 0xf65   : > { %5812 = vrcp.f32 %v3669_v25 }
 0xf67   : > { %v3672_v39 = vpop.xlane.xlu1 %3671 }
 0xf68   : > { %v3675_v11 = vpop.xlane.xlu0 %3674 }
 0xf6b   : > { %v3678_v47 = vpop.xlane.xlu1 %3677 }
 0xf6e   : > { %v5811_v61 = vpop.eup %5810 }
 0xf6f   : > { %v4206_v46 = vpop.xlane.xlu1 %4205  ;;  %v5813_v9 = vpop.eup %5812  ;;  %v3688_v10 = vmul.f32 %v5811_v61, %v7061_v63 }
 0xf70   : > { %v3681_v49 = vpop.xlane.xlu0 %3680  ;;  %5814 = vrcp.f32 %v4206_v46  ;;  %v3689_v42 = vmul.f32 %v5813_v9, %v7054_v58 }
 0xf71   : > { %5816 = vrcp.f32 %v3672_v39  ;;  %v3694_v29 = vadd.f32 %v3688_v10, %v3148_v14 }
 0xf72   : > { %5818 = vrcp.f32 %v3675_v11 }
 0xf73   : > { %v4212_v27 = vpop.xlane.xlu1 %4211  ;;  %5820 = vrcp.f32 %v3678_v47 }
 0xf74   : > { %v4209_v4 = vpop.xlane.xlu0 %4208  ;;  %5822 = vrcp.f32 %v4212_v27 }
 0xf75   : > { %5824 = vrcp.f32 %v4209_v4 }
 0xf77   : > { %v4218_v7 = vpop.xlane.xlu1 %4217 }
 0xf78   : > { %v4215_v51 = vpop.xlane.xlu0 %4214 }
 0xf7a   : > { %v5815_v0 = vpop.eup %5814 }
 0xf7b   : > { %v4746_v56 = vpop.xlane.xlu1 %4745  ;;  %v5817_v28 = vpop.eup %5816  ;;  %v4228_v18 = vmul.f32 %v5815_v0, %v7083_v43 }
 0xf7c   : > { %5826 = vrcp.f32 %v4746_v56  ;;  %v4221_v59 = vpop.xlane.xlu0 %4220  ;;  %v5819_v5 = vpop.eup %5818  ;;  %v3690_v22 = vmul.f32 %v5817_v28, %v7067_v17 }
 0xf7d   : > { %5828 = vrcp.f32 %v3681_v49  ;;  %v5821_v6 = vpop.eup %5820  ;;  %v4234_v21 = vadd.f32 %v4228_v18, %v3694_v29 }
 0xf7e   : > { %5830 = vrcp.f32 %v4218_v7  ;;  %v5823_v32 = vpop.eup %5822  ;;  %v3696_v47 = vadd.f32 %v3690_v22, %v3150_v33  ;;  %v3692_v11 = vmul.f32 %v5821_v6, %v7077_v31 }
 0xf7f   : > { %5832 = vrcp.f32 %v4215_v51  ;;  %v4752_v15 = vpop.xlane.xlu1 %4751  ;;  %v5825_v20 = vpop.eup %5824  ;;  %v4230_v43 = vmul.f32 %v5823_v32, %v7093_v50  ;;  %v3691_v50 = vmul.f32 %v5819_v5, %v7069_v2  ;;  %v3151_v51 = vmul.f32 %v5809_v60, %v7040_v45 }
 0xf80   : > { %5834 = vrcp.f32 %v4752_v15  ;;  %v4749_v1 = vpop.xlane.xlu0 %4748  ;;  %v4229_v39 = vmul.f32 %v5825_v20, %v7095_v55  ;;  %v3698_v44 = vadd.f32 %v3692_v11, %v3152_v40 }
 0xf81   : > { %5836 = vrcp.f32 %v4749_v1  ;;  %v4236_v27 = vadd.f32 %v4230_v43, %v3696_v47 }
 0xf82   : > { %5838 = vrcp.f32 %v3141_v38  ;;  %v3149_v38 = vmul.f32 %v5803_v52, %v7030_v8 }
 0xf83   : > { %5840 = vrcp.f32 %v4221_v59  ;;  %v4758_v30 = vpop.xlane.xlu1 %4757 }
 0xf84   : > { %5842 = vrcp.f32 %v4758_v30  ;;  %v4755_v35 = vpop.xlane.xlu0 %4754  ;;  %v3695_v49 = vadd.f32 %v3689_v42, %v3149_v38 }
 0xf85   : > { %5844 = vrcp.f32 %v4755_v35 }
 0xf86   : > { %v5827_v63 = vpop.eup %5826  ;;  %v4235_v31 = vadd.f32 %v4229_v39, %v3695_v49 }
 0xf87   : > { %v5829_v41 = vpop.eup %5828  ;;  %v4768_v34 = vmul.f32 %v5827_v63, %v7112_v23 }
 0xf88   : > { %v5831_v37 = vpop.eup %5830  ;;  %v4761_v25 = vpop.xlane.xlu0 %4760  ;;  %v3693_v45 = vmul.f32 %v5829_v41, %v7085_v48 }
 0xf89   : > { %v5833_v17 = vpop.eup %5832  ;;  %v4774_v58 = vadd.f32 %v4768_v34, %v4234_v21  ;;  %5846 = vrcp.f32 %v4761_v25  ;;  %v4232_v8 = vmul.f32 %v5831_v37, %v7103_v62 }
 0xf8a   : > { %v5835_v46 = vpop.eup %5834  ;;  %v4231_v26 = vmul.f32 %v5833_v17, %v7105_v3 }
 0xf8b   : > { %v5837_v23 = vpop.eup %5836  ;;  %v4780_v4 = vmul.f32 0.25, %v4774_v58  ;;  %v4770_v55 = vmul.f32 %v5835_v46, %v7120_v12  ;;  %v3697_v12 = vadd.f32 %v3691_v50, %v3151_v51 }
 0xf8c   : > { %v5839_v7 = vpop.eup %5838  ;;  %v4769_v52 = vmul.f32 %v5837_v23, %v7122_v13  ;;  %v4238_v13 = vadd.f32 %v4232_v8, %v3698_v44 }
 0xf8d   : > { %v5841_v54 = vpop.eup %5840  ;;  %4786 = vst.msk [vmem:[%s7194_s20] sm:$0x3] %vm3087_vm3, %v4780_v4  ;;  %v4776_v2 = vadd.f32 %v4770_v55, %v4236_v27  ;;  %v3153_v3 = vmul.f32 %v5839_v7, %v7046_v53  ;;  %v4237_v61 = vadd.f32 %v4231_v26, %v3697_v12 }
 0xf8e   : > { %v5843_v62 = vpop.eup %5842  ;;  %v4775_v56 = vadd.f32 %v4769_v52, %v4235_v31  ;;  %v4233_v9 = vmul.f32 %v5841_v54, %v7114_v24 }
 0xf8f   : > { %v5845_v57 = vpop.eup %5844  ;;  %v4782_v59 = vmul.f32 0.25, %v4776_v2  ;;  %v4772_v60 = vmul.f32 %v5843_v62, %v7128_v16  ;;  %v3699_v1 = vadd.f32 %v3693_v45, %v3153_v3 }
 0xf90   : > { %v4781_v15 = vmul.f32 0.25, %v4775_v56  ;;  %v4771_v0 = vmul.f32 %v5845_v57, %v7130_v36 }
 0xf91   : > { %4788 = vst.msk [vmem:[%s7194_s20 + $0x4] sm:$0x3] %vm3087_vm3, %v4782_v59  ;;  %v4778_v48 = vadd.f32 %v4772_v60, %v4238_v13  ;;  %v4239_v10 = vadd.f32 %v4233_v9, %v3699_v1 }
 0xf92   : > { %4787 = vst.msk [vmem:[%s7194_s20 + $0x2] sm:$0x3] %vm3087_vm3, %v4781_v15  ;;  %v4777_v53 = vadd.f32 %v4771_v0, %v4237_v61 }
 0xf93   : > { %v5847_v28 = vpop.eup %5846  ;;  %v4784_v16 = vmul.f32 0.25, %v4778_v48 }
 0xf94   : > { %v4783_v5 = vmul.f32 0.25, %v4777_v53  ;;  %v4773_v24 = vmul.f32 %v5847_v28, %v7136_v19 }
 0xf95   : > { %4790 = vst.msk [vmem:[%s7194_s20 + $0x8] sm:$0x3] %vm3087_vm3, %v4784_v16 }
 0xf96   : > { %4789 = vst.msk [vmem:[%s7194_s20 + $0x6] sm:$0x3] %vm3087_vm3, %v4783_v5  ;;  %v4779_v36 = vadd.f32 %v4773_v24, %v4239_v10 }
 0xf98   : > { %v4785_v6 = vmul.f32 0.25, %v4779_v36 }
 0xf9a   : > { %4791 = vst.msk [vmem:[%s7194_s20 + $0xa] sm:$0x3] %vm3087_vm3, %v4785_v6 }
 0xf9b   : > { %6037 = shalt.err (!%p6034_p0)
}
 0xf9c   : > { %s6038_s30 = scalar_lea.hbm %s7219_s11, 192  ;;  %s6042_s18 = scalar_lea.hbm %s7272_s8, 576 }
 0xf9d   : > { %p6039_p4 = scmp.ne.s32.totalorder %s7219_s11, %s6038_s30  ;;  %p6043_p6 = scmp.lt.u32.totalorder %s7219_s11, %s7272_s8 }
 0xf9e   : > { %p6044_p5 = scmp.lt.u32.totalorder %s6042_s18, %s6038_s30  ;;  %p6046_p11 = scmp.lt.u32.totalorder %s6038_s30, %s7219_s11 }
 0xf9f   : > { %p6040_p8 = pnand %p6039_p4, %p7324_p10 }
 0xfa0   : > { %p6045_p2 = por %p6044_p5, %p6043_p6 }
 0xfa1   : > { %p6041_p3 = pneg %p6040_p8 }
 0xfa2   : > { %p6047_p13 = por %p6046_p11, %p6045_p2 }
 0xfa4   : > { %p6048_p1 = pnand %p6047_p13, %p6041_p3 }
 0xfa6   : > { %6051 = shalt.err (!%p6048_p1)
}
 0xfa7   : > { %s6122_s3 = smov 32   ;;  %s6123_s21 = smov 2  }
 0xfa8   : > { %5623 = dma.vmem_to_hbm [thread:$0]  (%p7324_p10), %s7214_s14, 192, %s7219_s11, %s4798_s12, %s6122_s3, %s6122_s3, %s6123_s21  }
 0xfa9 PF: > { %s7325_s10 = sld [smem:[#allocation21_spill]]  ;;  %s7326_s29 = sld [smem:[#allocation19_spill]] }
 0xfaa   : > { %s7327_s20 = sld [smem:[#allocation24_spill]] }
 0xfaf   : > { %p5653_p9 = scmp.ge.s32.totalorder %s7325_s10, 2  ;;  %s4842_s24 = sand.u32 1, %s7326_s29  }
 0xfb0   : > { %p7328_p12 = scmp.ne.s32.totalorder %s7327_s20, 0  ;;  %s4843_s9 = scalar_lea.sflag [#allocation4], %s4842_s24 }
 0xfb2   : > { %p5644_p7 = pnand %p5653_p9, %p7328_p12 }
 0xfb4   : > { %6081 = dma.done.wait (!%p5644_p7), %s4843_s9, 256  }
 0xfb5   : > { %6083 = vsyncadd (!%p5644_p7), %s4843_s9, 4294967040  ;;  %s4852_s19 = scalar_lea.sflag [#allocation13], %s4842_s24 }
 0xfb6   : > { %6085 = dma.done.wait (!%p5644_p7), %s4852_s19, 192  }
 0xfb7   : > { %6087 = vsyncadd (!%p5644_p7), %s4852_s19, 4294967104  ;;  %s7329_s30 = sld [smem:[#allocation22_spill]]  ;;  %s7330_s15 = sld [smem:[#allocation20_spill]] }
 0xfb8   : > { %s7331_s29 = sld [smem:[#allocation23_spill]]  ;;  %s7332_s27 = smov %s6094_s28 }
 0xfbd   : > { %p29_p10 = scmp.ge.s32.totalorder %s7329_s30, 5   ;;  %s7333_s28 = smov %s7330_s15 }
 0xfbf   :  { %31 = sbr.rel (!%p29_p10) target bundleno = 13 (0xd), region = 156 }
 0xfc6   :  { %4857 = vsyncpa [#allocation3], 1 }
 0xfc7   :  { %4859 = vsyncpa [#allocation3 + $0x1], 1 }
 0xfc8   :  { %4860 = vsyncpa [#allocation6], 1 }
 0xfc9   :  { %4862 = vsyncpa [#allocation6 + $0x1], 1 }
 0xfca   :  { %4863 = vsyncpa [#allocation9], 1 }
 0xfcb   :  { %4865 = vsyncpa [#allocation9 + $0x1], 1 }
 0xfcc   :  { %4866 = vsyncpa [#allocation4], 1 }
 0xfcd   :  { %4868 = vsyncpa [#allocation4 + $0x1], 1 }
 0xfce   :  { %4869 = vsyncpa [#allocation13], 1 }
 0xfcf   :  { %4871 = vsyncpa [#allocation13 + $0x1], 1 }

</bundles_post_ra>
